<compile_context>
chip_gen: v7x
topology: tpu7x:2x2x1
jax: 0.10.0
libtpu: 0.0.40
codegen_flags: <defaults>
</compile_context>

<pallas_src>
import math
from functools import partial

import jax
import jax.numpy as jnp
from jax.experimental import pallas as pl
from jax.experimental.pallas import tpu as pltpu

N_PAD = 128  # lane-dense width for the final output slab


# ----------------------------- fused Pallas kernel --------------------------------

def _fused_tst_kernel(x_ref, pe_ref, pw_ref, pb_ref,
                      win_ref, bin_ref, wo_ref, bo_ref,
                      w1_ref, b1_ref, w2_ref, b2_ref,
                      g1_ref, be1_ref, g2_ref, be2_ref,
                      ow_ref, ob_ref, o_ref,
                      *, num_layers, batch, seq, n_heads, d_model):
    f32 = jnp.float32
    hd = d_model // n_heads
    attn_scale = 1.0 / math.sqrt(hd)
    inv_sqrt2 = 1.0 / math.sqrt(2.0)
    bt = batch * seq

    def layernorm(z, g, beta):                      # eps=1e-5 (PyTorch default)
        mu = jnp.mean(z, axis=-1, keepdims=True)
        zc = z - mu
        var = jnp.mean(zc * zc, axis=-1, keepdims=True)
        return zc * jax.lax.rsqrt(var + 1e-5) * g + beta

    # --- input projection * sqrt(d_model) + fixed positional encoding -------------
    x = x_ref[...]                                   # (b*t, feat)
    h = jnp.dot(x, pw_ref[...], preferred_element_type=f32) + pb_ref[...]
    h = h * math.sqrt(d_model)
    # pe is (t, d_model); broadcast over batch.  Reshapes only regroup the row
    # (sublane) dim at a multiple of 8 -> layout no-op.
    h = (h.reshape(batch, seq, d_model) + pe_ref[...]).reshape(bt, d_model)

    # --- post-norm TransformerEncoderLayer stack (statically unrolled) ------------
    for li in range(num_layers):
        # fused QKV projection: one MXU matmul for all heads
        qkv = jnp.dot(h, win_ref[li], preferred_element_type=f32) + bin_ref[li]

        # gather heads once, stack (head, batch) along a leading batch dim
        q_l, k_l, v_l = [], [], []
        for hi in range(n_heads):
            c = hi * hd
            q_l.append(qkv[:, c:c + hd].reshape(batch, seq, hd))
            k_l.append(qkv[:, d_model + c:d_model + c + hd].reshape(batch, seq, hd))
            v_l.append(qkv[:, 2 * d_model + c:2 * d_model + c + hd]
                       .reshape(batch, seq, hd))
        q = jnp.concatenate(q_l, axis=0)             # (n_heads*batch, t, hd)
        k = jnp.concatenate(k_l, axis=0)
        v = jnp.concatenate(v_l, axis=0)

        # batched attention: 2 einsums + one batched softmax for the whole layer
        s = jnp.einsum('bqd,bkd->bqk', q, k,
                       preferred_element_type=f32) * attn_scale
        m = jnp.max(s, axis=-1, keepdims=True)
        e = jnp.exp(s - m)
        p = e * pl.reciprocal(jnp.sum(e, axis=-1, keepdims=True), approx=True)
        ctx = jnp.einsum('bqk,bkd->bqd', p, v,
                         preferred_element_type=f32)  # (n_heads*batch, t, hd)

        # reassemble heads along lanes and do ONE out-projection matmul
        attn = jnp.concatenate(
            [ctx[hi * batch:(hi + 1) * batch].reshape(bt, hd)
             for hi in range(n_heads)], axis=-1)      # (b*t, d_model)
        src2 = jnp.dot(attn, wo_ref[li], preferred_element_type=f32) + bo_ref[li]

        # src = norm1(src + dropout(src2))   (dropout = identity)
        h = layernorm(h + src2, g1_ref[li], be1_ref[li])

        # feed-forward: linear1 -> exact-erf GELU -> linear2
        ff = jnp.dot(h, w1_ref[li], preferred_element_type=f32) + b1_ref[li]
        ff = 0.5 * ff * (1.0 + jax.lax.erf(ff * inv_sqrt2))
        ff = jnp.dot(ff, w2_ref[li], preferred_element_type=f32) + b2_ref[li]

        # src = norm2(src + dropout(ff))
        h = layernorm(h + ff, g2_ref[li], be2_ref[li])

    # --- LeakyReLU (slope 0.01) + output linear (lane-padded to 128) ---------------
    h = jnp.maximum(h, 0.01 * h)
    o_ref[...] = jnp.dot(h, ow_ref[...], preferred_element_type=f32) + ob_ref[...]


# ----------------------------- wrapper / glue -------------------------------------

def _full_spec(shape):
    nd = len(shape)
    return pl.BlockSpec(shape, lambda i, _nd=nd: (0,) * _nd)


@partial(jax.jit, static_argnames=("d_model", "n_heads", "horizon", "num_nodes"))
def ts_transformer_forward(X, kparams, pe, *, d_model, n_heads, horizon, num_nodes):
    b, n, t, d = X.shape
    feat = n * d
    num_layers = kparams["w_in"].shape[0]

    # X.permute(2,0,1,3).reshape(t,b,-1), kept batch-major: row = bi*t + ti
    x2d = jnp.transpose(X, (0, 2, 1, 3)).reshape(b * t, feat)
    pe2d = pe[:t, :]                                  # (t, d_model)

    args = (x2d, pe2d,
            kparams["proj_w"], kparams["proj_b"],
            kparams["w_in"], kparams["b_in"], kparams["w_o"], kparams["b_o"],
            kparams["w1"], kparams["b1"], kparams["w2"], kparams["b2"],
            kparams["ln1_g"], kparams["ln1_b"], kparams["ln2_g"], kparams["ln2_b"],
            kparams["out_w_pad"], kparams["out_b_pad"])

    out2d = pl.pallas_call(
        partial(_fused_tst_kernel, num_layers=num_layers, batch=b, seq=t,
                n_heads=n_heads, d_model=d_model),
        out_shape=jax.ShapeDtypeStruct((b * t, N_PAD), jnp.float32),
        grid=(1,),
        in_specs=[_full_spec(a.shape) for a in args],
        out_specs=_full_spec((b * t, N_PAD)),
        compiler_params=pltpu.CompilerParams(dimension_semantics=("arbitrary",)),
    )(*args)

    # output_layer(...)[:, :horizon, :].permute(1,0,2).squeeze(dim=0)
    out = out2d.reshape(b, t, N_PAD)[:, :horizon, :num_nodes]  # (b, horizon, nodes)
    out = jnp.transpose(out, (1, 0, 2))                        # (horizon, b, nodes)
    if horizon == 1:
        out = out[0]
    return out


# ----------------------------- model setup (plain JAX) ----------------------------

def fixed_pos_encoding(max_len, d_model):
    position = jnp.arange(max_len, dtype=jnp.float32)[:, None]
    div_term = jnp.exp(jnp.arange(0, d_model, 2, dtype=jnp.float32)
                       * (-math.log(10000.0) / d_model))
    pe = jnp.zeros((max_len, d_model), jnp.float32)
    pe = pe.at[:, 0::2].set(jnp.sin(position * div_term))
    pe = pe.at[:, 1::2].set(jnp.cos(position * div_term))
    return pe                                          # (max_len, d_model)


def init_params(key, feat_dim, d_model, n_heads, dff, num_layers, num_nodes):
    ks = jax.random.split(key, 6)

    def dense(k, shape, s=0.05):
        return jax.random.normal(k, shape, jnp.float32) * s

    # QKV weight columns are ordered [q | k | v]; heads are contiguous hd-wide blocks,
    # matching PyTorch MultiheadAttention's in_proj / head-split convention.
    return {
        "proj_w": dense(ks[0], (feat_dim, d_model)),
        "proj_b": jnp.zeros((d_model,), jnp.float32),
        "out_w": dense(ks[1], (d_model, num_nodes)),
        "out_b": jnp.zeros((num_nodes,), jnp.float32),
        "w_in": dense(ks[2], (num_layers, d_model, 3 * d_model)),
        "b_in": jnp.zeros((num_layers, 1, 3 * d_model), jnp.float32),
        "w_o": dense(ks[3], (num_layers, d_model, d_model)),
        "b_o": jnp.zeros((num_layers, 1, d_model), jnp.float32),
        "w1": dense(ks[4], (num_layers, d_model, dff)),
        "b1": jnp.zeros((num_layers, 1, dff), jnp.float32),
        "w2": dense(ks[5], (num_layers, dff, d_model)),
        "b2": jnp.zeros((num_layers, 1, d_model), jnp.float32),
        "ln1_g": jnp.ones((num_layers, 1, d_model), jnp.float32),
        "ln1_b": jnp.zeros((num_layers, 1, d_model), jnp.float32),
        "ln2_g": jnp.ones((num_layers, 1, d_model), jnp.float32),
        "ln2_b": jnp.zeros((num_layers, 1, d_model), jnp.float32),
    }


def prepare_params(params, d_model):
    """One-time kernel-ready prep (hoisted out of the jitted forward):
    pad the output projection to a lane-dense 128-wide slab, reshape biases."""
    num_nodes = params["out_w"].shape[1]
    ow = jnp.zeros((d_model, N_PAD), jnp.float32).at[:, :num_nodes].set(params["out_w"])
    ob = jnp.zeros((1, N_PAD), jnp.float32).at[:, :num_nodes].set(
        params["out_b"].reshape(1, -1))
    kp = {k: v for k, v in params.items() if k not in ("out_w", "out_b", "proj_b")}
    kp["proj_b"] = params["proj_b"].reshape(1, -1)
    kp["out_w_pad"] = ow
    kp["out_b_pad"] = ob
    return kp, num_nodes


# ----------------------------- main -----------------------------------------------

if __name__ == "__main__":
    # args: num_nodes=4, input_dim=2 (feat_dim=8), max_len=16, d_model=32, n_heads=4,
    #       dim_feedforward=64, num_layers=2, horizon=1, dropout=0.0 (inference)
    B, N, T, D = 2, 4, 8, 2
    d_model, n_heads, dff, num_layers = 32, 4, 64, 2
    horizon, max_len = 1, 16

    key = jax.random.PRNGKey(0)
    xk, pk = jax.random.split(key)
    X = jax.random.normal(xk, (B, N, T, D), jnp.float32)

    params = init_params(pk, N * D, d_model, n_heads, dff, num_layers, N)
    pe = fixed_pos_encoding(max_len, d_model)
    kparams, num_nodes = prepare_params(params, d_model)   # one-time prep, outside jit

    out = ts_transformer_forward(X, kparams, pe, d_model=d_model, n_heads=n_heads,
                                 horizon=horizon, num_nodes=num_nodes)
    out = jax.block_until_ready(out)
    assert out.shape == (B, N), out.shape
    assert bool(jnp.all(jnp.isfinite(out)))
    print("KERNEL_OK")
</pallas_src>

<mosaic_0001>
module attributes {stable_mosaic.version = 11 : i64} {
  func.func @_fused_tst_kernel(%arg0: i32, %arg1: memref<16x8xf32, #tpu.memory_space<vmem>>, %arg2: memref<8x32xf32, #tpu.memory_space<vmem>>, %arg3: memref<8x32xf32, #tpu.memory_space<vmem>>, %arg4: memref<1x32xf32, #tpu.memory_space<vmem>>, %arg5: memref<2x32x96xf32, #tpu.memory_space<vmem>>, %arg6: memref<2x1x96xf32, #tpu.memory_space<vmem>>, %arg7: memref<2x32x32xf32, #tpu.memory_space<vmem>>, %arg8: memref<2x1x32xf32, #tpu.memory_space<vmem>>, %arg9: memref<2x32x64xf32, #tpu.memory_space<vmem>>, %arg10: memref<2x1x64xf32, #tpu.memory_space<vmem>>, %arg11: memref<2x64x32xf32, #tpu.memory_space<vmem>>, %arg12: memref<2x1x32xf32, #tpu.memory_space<vmem>>, %arg13: memref<2x1x32xf32, #tpu.memory_space<vmem>>, %arg14: memref<2x1x32xf32, #tpu.memory_space<vmem>>, %arg15: memref<2x1x32xf32, #tpu.memory_space<vmem>>, %arg16: memref<2x1x32xf32, #tpu.memory_space<vmem>>, %arg17: memref<32x128xf32, #tpu.memory_space<vmem>>, %arg18: memref<1x128xf32, #tpu.memory_space<vmem>>, %arg19: memref<16x128xf32, #tpu.memory_space<vmem>>) attributes {dimension_semantics = [#tpu.dimension_semantics<arbitrary>], iteration_bounds = array<i64: 1>, scalar_prefetch = 0 : i64, scratch_operands = 0 : i64, tpu.core_type = #tpu.core_type<tc>, window_params = [{pipeline_mode = #tpu.pipeline_mode<synchronous>, transform_indices = @transform_0, window_bounds = array<i64: 16, 8>}, {pipeline_mode = #tpu.pipeline_mode<synchronous>, transform_indices = @transform_1, window_bounds = array<i64: 8, 32>}, {pipeline_mode = #tpu.pipeline_mode<synchronous>, transform_indices = @transform_2, window_bounds = array<i64: 8, 32>}, {pipeline_mode = #tpu.pipeline_mode<synchronous>, transform_indices = @transform_3, window_bounds = array<i64: 1, 32>}, {pipeline_mode = #tpu.pipeline_mode<synchronous>, transform_indices = @transform_4, window_bounds = array<i64: 2, 32, 96>}, {pipeline_mode = #tpu.pipeline_mode<synchronous>, transform_indices = @transform_5, window_bounds = array<i64: 2, 1, 96>}, {pipeline_mode = #tpu.pipeline_mode<synchronous>, transform_indices = @transform_6, window_bounds = array<i64: 2, 32, 32>}, {pipeline_mode = #tpu.pipeline_mode<synchronous>, transform_indices = @transform_7, window_bounds = array<i64: 2, 1, 32>}, {pipeline_mode = #tpu.pipeline_mode<synchronous>, transform_indices = @transform_8, window_bounds = array<i64: 2, 32, 64>}, {pipeline_mode = #tpu.pipeline_mode<synchronous>, transform_indices = @transform_9, window_bounds = array<i64: 2, 1, 64>}, {pipeline_mode = #tpu.pipeline_mode<synchronous>, transform_indices = @transform_10, window_bounds = array<i64: 2, 64, 32>}, {pipeline_mode = #tpu.pipeline_mode<synchronous>, transform_indices = @transform_11, window_bounds = array<i64: 2, 1, 32>}, {pipeline_mode = #tpu.pipeline_mode<synchronous>, transform_indices = @transform_12, window_bounds = array<i64: 2, 1, 32>}, {pipeline_mode = #tpu.pipeline_mode<synchronous>, transform_indices = @transform_13, window_bounds = array<i64: 2, 1, 32>}, {pipeline_mode = #tpu.pipeline_mode<synchronous>, transform_indices = @transform_14, window_bounds = array<i64: 2, 1, 32>}, {pipeline_mode = #tpu.pipeline_mode<synchronous>, transform_indices = @transform_15, window_bounds = array<i64: 2, 1, 32>}, {pipeline_mode = #tpu.pipeline_mode<synchronous>, transform_indices = @transform_16, window_bounds = array<i64: 32, 128>}, {pipeline_mode = #tpu.pipeline_mode<synchronous>, transform_indices = @transform_17, window_bounds = array<i64: 1, 128>}, {pipeline_mode = #tpu.pipeline_mode<synchronous>, transform_indices = @transform_18, window_bounds = array<i64: 16, 128>}]} {
    %c0 = arith.constant 0 : index
    %c0_0 = arith.constant 0 : index
    %0 = vector.load %arg1[%c0, %c0_0] : memref<16x8xf32, #tpu.memory_space<vmem>>, vector<16x8xf32>
    %c0_1 = arith.constant 0 : index
    %c0_2 = arith.constant 0 : index
    %1 = vector.load %arg3[%c0_1, %c0_2] : memref<8x32xf32, #tpu.memory_space<vmem>>, vector<8x32xf32>
    %cst = arith.constant dense<0.000000e+00> : vector<16x32xf32>
    %2 = tpu.matmul %0, %1, %cst {dimension_numbers = #tpu.dot_dimension_numbers<[1], [0], [0], [1], [0, 0, 1, 1], [], []>} : vector<16x8xf32>, vector<8x32xf32>, vector<16x32xf32> -> vector<16x32xf32>
    %c0_3 = arith.constant 0 : index
    %c0_4 = arith.constant 0 : index
    %3 = vector.load %arg4[%c0_3, %c0_4] : memref<1x32xf32, #tpu.memory_space<vmem>>, vector<1x32xf32>
    %4 = vector.broadcast %3 : vector<1x32xf32> to vector<16x32xf32>
    %5 = arith.addf %2, %4 : vector<16x32xf32>
    %cst_5 = arith.constant 5.65685415 : f32
    %6 = vector.broadcast %cst_5 : f32 to vector<16x32xf32>
    %7 = arith.mulf %5, %6 : vector<16x32xf32>
    %8 = vector.shape_cast %7 : vector<16x32xf32> to vector<2x8x32xf32>
    %c0_6 = arith.constant 0 : index
    %c0_7 = arith.constant 0 : index
    %9 = vector.load %arg2[%c0_6, %c0_7] : memref<8x32xf32, #tpu.memory_space<vmem>>, vector<8x32xf32>
    %10 = vector.shape_cast %9 : vector<8x32xf32> to vector<1x8x32xf32>
    %11 = vector.broadcast %10 : vector<1x8x32xf32> to vector<2x8x32xf32>
    %12 = arith.addf %8, %11 : vector<2x8x32xf32>
    %13 = vector.shape_cast %12 : vector<2x8x32xf32> to vector<16x32xf32>
    %c0_8 = arith.constant 0 : index
    %c0_9 = arith.constant 0 : index
    %c0_10 = arith.constant 0 : index
    %14 = vector.load %arg5[%c0_8, %c0_9, %c0_10] : memref<2x32x96xf32, #tpu.memory_space<vmem>>, vector<1x32x96xf32>
    %15 = vector.shape_cast %14 : vector<1x32x96xf32> to vector<32x96xf32>
    %cst_11 = arith.constant dense<0.000000e+00> : vector<16x96xf32>
    %16 = tpu.matmul %13, %15, %cst_11 {dimension_numbers = #tpu.dot_dimension_numbers<[1], [0], [0], [1], [0, 0, 1, 1], [], []>} : vector<16x32xf32>, vector<32x96xf32>, vector<16x96xf32> -> vector<16x96xf32>
    %c0_12 = arith.constant 0 : index
    %c0_13 = arith.constant 0 : index
    %c0_14 = arith.constant 0 : index
    %17 = vector.load %arg6[%c0_12, %c0_13, %c0_14] : memref<2x1x96xf32, #tpu.memory_space<vmem>>, vector<1x1x96xf32>
    %18 = vector.shape_cast %17 : vector<1x1x96xf32> to vector<1x96xf32>
    %19 = vector.broadcast %18 : vector<1x96xf32> to vector<16x96xf32>
    %20 = arith.addf %16, %19 : vector<16x96xf32>
    %21 = vector.extract_strided_slice %20 {offsets = [0, 0], sizes = [16, 8], strides = [1, 1]} : vector<16x96xf32> to vector<16x8xf32>
    %22 = vector.shape_cast %21 : vector<16x8xf32> to vector<2x8x8xf32>
    %23 = vector.extract_strided_slice %20 {offsets = [0, 32], sizes = [16, 8], strides = [1, 1]} : vector<16x96xf32> to vector<16x8xf32>
    %24 = vector.shape_cast %23 : vector<16x8xf32> to vector<2x8x8xf32>
    %25 = vector.extract_strided_slice %20 {offsets = [0, 64], sizes = [16, 8], strides = [1, 1]} : vector<16x96xf32> to vector<16x8xf32>
    %26 = vector.shape_cast %25 : vector<16x8xf32> to vector<2x8x8xf32>
    %27 = vector.extract_strided_slice %20 {offsets = [0, 8], sizes = [16, 8], strides = [1, 1]} : vector<16x96xf32> to vector<16x8xf32>
    %28 = vector.shape_cast %27 : vector<16x8xf32> to vector<2x8x8xf32>
    %29 = vector.extract_strided_slice %20 {offsets = [0, 40], sizes = [16, 8], strides = [1, 1]} : vector<16x96xf32> to vector<16x8xf32>
    %30 = vector.shape_cast %29 : vector<16x8xf32> to vector<2x8x8xf32>
    %31 = vector.extract_strided_slice %20 {offsets = [0, 72], sizes = [16, 8], strides = [1, 1]} : vector<16x96xf32> to vector<16x8xf32>
    %32 = vector.shape_cast %31 : vector<16x8xf32> to vector<2x8x8xf32>
    %33 = vector.extract_strided_slice %20 {offsets = [0, 16], sizes = [16, 8], strides = [1, 1]} : vector<16x96xf32> to vector<16x8xf32>
    %34 = vector.shape_cast %33 : vector<16x8xf32> to vector<2x8x8xf32>
    %35 = vector.extract_strided_slice %20 {offsets = [0, 48], sizes = [16, 8], strides = [1, 1]} : vector<16x96xf32> to vector<16x8xf32>
    %36 = vector.shape_cast %35 : vector<16x8xf32> to vector<2x8x8xf32>
    %37 = vector.extract_strided_slice %20 {offsets = [0, 80], sizes = [16, 8], strides = [1, 1]} : vector<16x96xf32> to vector<16x8xf32>
    %38 = vector.shape_cast %37 : vector<16x8xf32> to vector<2x8x8xf32>
    %39 = vector.extract_strided_slice %20 {offsets = [0, 24], sizes = [16, 8], strides = [1, 1]} : vector<16x96xf32> to vector<16x8xf32>
    %40 = vector.shape_cast %39 : vector<16x8xf32> to vector<2x8x8xf32>
    %41 = vector.extract_strided_slice %20 {offsets = [0, 56], sizes = [16, 8], strides = [1, 1]} : vector<16x96xf32> to vector<16x8xf32>
    %42 = vector.shape_cast %41 : vector<16x8xf32> to vector<2x8x8xf32>
    %43 = vector.extract_strided_slice %20 {offsets = [0, 88], sizes = [16, 8], strides = [1, 1]} : vector<16x96xf32> to vector<16x8xf32>
    %44 = vector.shape_cast %43 : vector<16x8xf32> to vector<2x8x8xf32>
    %45 = tpu.concatenate %22, %28, %34, %40 in 0 : vector<2x8x8xf32>, vector<2x8x8xf32>, vector<2x8x8xf32>, vector<2x8x8xf32> -> vector<8x8x8xf32>
    %46 = tpu.concatenate %24, %30, %36, %42 in 0 : vector<2x8x8xf32>, vector<2x8x8xf32>, vector<2x8x8xf32>, vector<2x8x8xf32> -> vector<8x8x8xf32>
    %47 = tpu.concatenate %26, %32, %38, %44 in 0 : vector<2x8x8xf32>, vector<2x8x8xf32>, vector<2x8x8xf32>, vector<2x8x8xf32> -> vector<8x8x8xf32>
    "tpu.trace_start"() <{level = 10 : i32, message = "bqd,bkd->bqk"}> : () -> ()
    %cst_15 = arith.constant dense<0.000000e+00> : vector<8x8x8xf32>
    %48 = tpu.matmul %45, %46, %cst_15 {dimension_numbers = #tpu.dot_dimension_numbers<[2], [2], [1], [1], [0, 0, 0, 1, 1, 1], [0], [0]>} : vector<8x8x8xf32>, vector<8x8x8xf32>, vector<8x8x8xf32> -> vector<8x8x8xf32>
    "tpu.trace_stop"() : () -> ()
    %cst_16 = arith.constant 0.353553385 : f32
    %49 = vector.broadcast %cst_16 : f32 to vector<8x8x8xf32>
    %50 = arith.mulf %48, %49 : vector<8x8x8xf32>
    %cst_17 = arith.constant dense<0xFF800000> : vector<8x8xf32>
    %51 = vector.multi_reduction <maximumf>, %50, %cst_17 [2] : vector<8x8x8xf32> to vector<8x8xf32>
    %52 = vector.shape_cast %51 : vector<8x8xf32> to vector<8x8x1xf32>
    %53 = vector.broadcast %52 : vector<8x8x1xf32> to vector<8x8x8xf32>
    %54 = arith.subf %50, %53 : vector<8x8x8xf32>
    %55 = math.exp %54 : vector<8x8x8xf32>
    %cst_18 = arith.constant dense<0.000000e+00> : vector<8x8xf32>
    %56 = vector.multi_reduction <add>, %55, %cst_18 [2] : vector<8x8x8xf32> to vector<8x8xf32>
    %57 = vector.shape_cast %56 : vector<8x8xf32> to vector<8x8x1xf32>
    %58 = tpu.reciprocal %57 {approx = true} : vector<8x8x1xf32> -> vector<8x8x1xf32>
    %59 = vector.broadcast %58 : vector<8x8x1xf32> to vector<8x8x8xf32>
    %60 = arith.mulf %55, %59 : vector<8x8x8xf32>
    "tpu.trace_start"() <{level = 10 : i32, message = "bqk,bkd->bqd"}> : () -> ()
    %cst_19 = arith.constant dense<0.000000e+00> : vector<8x8x8xf32>
    %61 = tpu.matmul %60, %47, %cst_19 {dimension_numbers = #tpu.dot_dimension_numbers<[2], [1], [1], [2], [0, 0, 0, 1, 1, 2], [0], [0]>} : vector<8x8x8xf32>, vector<8x8x8xf32>, vector<8x8x8xf32> -> vector<8x8x8xf32>
    "tpu.trace_stop"() : () -> ()
    %62 = vector.extract_strided_slice %61 {offsets = [0, 0, 0], sizes = [2, 8, 8], strides = [1, 1, 1]} : vector<8x8x8xf32> to vector<2x8x8xf32>
    %63 = vector.shape_cast %62 : vector<2x8x8xf32> to vector<16x8xf32>
    %64 = vector.extract_strided_slice %61 {offsets = [2, 0, 0], sizes = [2, 8, 8], strides = [1, 1, 1]} : vector<8x8x8xf32> to vector<2x8x8xf32>
    %65 = vector.shape_cast %64 : vector<2x8x8xf32> to vector<16x8xf32>
    %66 = vector.extract_strided_slice %61 {offsets = [4, 0, 0], sizes = [2, 8, 8], strides = [1, 1, 1]} : vector<8x8x8xf32> to vector<2x8x8xf32>
    %67 = vector.shape_cast %66 : vector<2x8x8xf32> to vector<16x8xf32>
    %68 = vector.extract_strided_slice %61 {offsets = [6, 0, 0], sizes = [2, 8, 8], strides = [1, 1, 1]} : vector<8x8x8xf32> to vector<2x8x8xf32>
    %69 = vector.shape_cast %68 : vector<2x8x8xf32> to vector<16x8xf32>
    %70 = tpu.concatenate %63, %65, %67, %69 in 1 : vector<16x8xf32>, vector<16x8xf32>, vector<16x8xf32>, vector<16x8xf32> -> vector<16x32xf32>
    %c0_20 = arith.constant 0 : index
    %c0_21 = arith.constant 0 : index
    %c0_22 = arith.constant 0 : index
    %71 = vector.load %arg7[%c0_20, %c0_21, %c0_22] : memref<2x32x32xf32, #tpu.memory_space<vmem>>, vector<1x32x32xf32>
    %72 = vector.shape_cast %71 : vector<1x32x32xf32> to vector<32x32xf32>
    %cst_23 = arith.constant dense<0.000000e+00> : vector<16x32xf32>
    %73 = tpu.matmul %70, %72, %cst_23 {dimension_numbers = #tpu.dot_dimension_numbers<[1], [0], [0], [1], [0, 0, 1, 1], [], []>} : vector<16x32xf32>, vector<32x32xf32>, vector<16x32xf32> -> vector<16x32xf32>
    %c0_24 = arith.constant 0 : index
    %c0_25 = arith.constant 0 : index
    %c0_26 = arith.constant 0 : index
    %74 = vector.load %arg8[%c0_24, %c0_25, %c0_26] : memref<2x1x32xf32, #tpu.memory_space<vmem>>, vector<1x1x32xf32>
    %75 = vector.shape_cast %74 : vector<1x1x32xf32> to vector<1x32xf32>
    %76 = vector.broadcast %75 : vector<1x32xf32> to vector<16x32xf32>
    %77 = arith.addf %73, %76 : vector<16x32xf32>
    %78 = arith.addf %13, %77 : vector<16x32xf32>
    %c0_27 = arith.constant 0 : index
    %c0_28 = arith.constant 0 : index
    %c0_29 = arith.constant 0 : index
    %79 = vector.load %arg13[%c0_27, %c0_28, %c0_29] : memref<2x1x32xf32, #tpu.memory_space<vmem>>, vector<1x1x32xf32>
    %80 = vector.shape_cast %79 : vector<1x1x32xf32> to vector<1x32xf32>
    %c0_30 = arith.constant 0 : index
    %c0_31 = arith.constant 0 : index
    %c0_32 = arith.constant 0 : index
    %81 = vector.load %arg14[%c0_30, %c0_31, %c0_32] : memref<2x1x32xf32, #tpu.memory_space<vmem>>, vector<1x1x32xf32>
    %82 = vector.shape_cast %81 : vector<1x1x32xf32> to vector<1x32xf32>
    %cst_33 = arith.constant dense<0.000000e+00> : vector<16xf32>
    %83 = vector.multi_reduction <add>, %78, %cst_33 [1] : vector<16x32xf32> to vector<16xf32>
    %84 = vector.shape_cast %83 : vector<16xf32> to vector<16x1xf32>
    %cst_34 = arith.constant 3.200000e+01 : f32
    %85 = vector.broadcast %cst_34 : f32 to vector<16x1xf32>
    %86 = arith.divf %84, %85 : vector<16x1xf32>
    %87 = vector.broadcast %86 : vector<16x1xf32> to vector<16x32xf32>
    %88 = arith.subf %78, %87 : vector<16x32xf32>
    %89 = arith.mulf %88, %88 : vector<16x32xf32>
    %cst_35 = arith.constant dense<0.000000e+00> : vector<16xf32>
    %90 = vector.multi_reduction <add>, %89, %cst_35 [1] : vector<16x32xf32> to vector<16xf32>
    %91 = vector.shape_cast %90 : vector<16xf32> to vector<16x1xf32>
    %cst_36 = arith.constant 3.200000e+01 : f32
    %92 = vector.broadcast %cst_36 : f32 to vector<16x1xf32>
    %93 = arith.divf %91, %92 : vector<16x1xf32>
    %cst_37 = arith.constant 9.99999974E-6 : f32
    %94 = vector.broadcast %cst_37 : f32 to vector<16x1xf32>
    %95 = arith.addf %93, %94 : vector<16x1xf32>
    %96 = math.rsqrt %95 : vector<16x1xf32>
    %97 = vector.broadcast %96 : vector<16x1xf32> to vector<16x32xf32>
    %98 = arith.mulf %88, %97 : vector<16x32xf32>
    %99 = vector.broadcast %80 : vector<1x32xf32> to vector<16x32xf32>
    %100 = arith.mulf %98, %99 : vector<16x32xf32>
    %101 = vector.broadcast %82 : vector<1x32xf32> to vector<16x32xf32>
    %102 = arith.addf %100, %101 : vector<16x32xf32>
    %c0_38 = arith.constant 0 : index
    %c0_39 = arith.constant 0 : index
    %c0_40 = arith.constant 0 : index
    %103 = vector.load %arg9[%c0_38, %c0_39, %c0_40] : memref<2x32x64xf32, #tpu.memory_space<vmem>>, vector<1x32x64xf32>
    %104 = vector.shape_cast %103 : vector<1x32x64xf32> to vector<32x64xf32>
    %cst_41 = arith.constant dense<0.000000e+00> : vector<16x64xf32>
    %105 = tpu.matmul %102, %104, %cst_41 {dimension_numbers = #tpu.dot_dimension_numbers<[1], [0], [0], [1], [0, 0, 1, 1], [], []>} : vector<16x32xf32>, vector<32x64xf32>, vector<16x64xf32> -> vector<16x64xf32>
    %c0_42 = arith.constant 0 : index
    %c0_43 = arith.constant 0 : index
    %c0_44 = arith.constant 0 : index
    %106 = vector.load %arg10[%c0_42, %c0_43, %c0_44] : memref<2x1x64xf32, #tpu.memory_space<vmem>>, vector<1x1x64xf32>
    %107 = vector.shape_cast %106 : vector<1x1x64xf32> to vector<1x64xf32>
    %108 = vector.broadcast %107 : vector<1x64xf32> to vector<16x64xf32>
    %109 = arith.addf %105, %108 : vector<16x64xf32>
    %cst_45 = arith.constant 5.000000e-01 : f32
    %110 = vector.broadcast %cst_45 : f32 to vector<16x64xf32>
    %111 = arith.mulf %110, %109 : vector<16x64xf32>
    %cst_46 = arith.constant 0.707106769 : f32
    %112 = vector.broadcast %cst_46 : f32 to vector<16x64xf32>
    %113 = arith.mulf %109, %112 : vector<16x64xf32>
    %114 = math.erf %113 : vector<16x64xf32>
    %cst_47 = arith.constant 1.000000e+00 : f32
    %115 = vector.broadcast %cst_47 : f32 to vector<16x64xf32>
    %116 = arith.addf %115, %114 : vector<16x64xf32>
    %117 = arith.mulf %111, %116 : vector<16x64xf32>
    %c0_48 = arith.constant 0 : index
    %c0_49 = arith.constant 0 : index
    %c0_50 = arith.constant 0 : index
    %118 = vector.load %arg11[%c0_48, %c0_49, %c0_50] : memref<2x64x32xf32, #tpu.memory_space<vmem>>, vector<1x64x32xf32>
    %119 = vector.shape_cast %118 : vector<1x64x32xf32> to vector<64x32xf32>
    %cst_51 = arith.constant dense<0.000000e+00> : vector<16x32xf32>
    %120 = tpu.matmul %117, %119, %cst_51 {dimension_numbers = #tpu.dot_dimension_numbers<[1], [0], [0], [1], [0, 0, 1, 1], [], []>} : vector<16x64xf32>, vector<64x32xf32>, vector<16x32xf32> -> vector<16x32xf32>
    %c0_52 = arith.constant 0 : index
    %c0_53 = arith.constant 0 : index
    %c0_54 = arith.constant 0 : index
    %121 = vector.load %arg12[%c0_52, %c0_53, %c0_54] : memref<2x1x32xf32, #tpu.memory_space<vmem>>, vector<1x1x32xf32>
    %122 = vector.shape_cast %121 : vector<1x1x32xf32> to vector<1x32xf32>
    %123 = vector.broadcast %122 : vector<1x32xf32> to vector<16x32xf32>
    %124 = arith.addf %120, %123 : vector<16x32xf32>
    %125 = arith.addf %102, %124 : vector<16x32xf32>
    %c0_55 = arith.constant 0 : index
    %c0_56 = arith.constant 0 : index
    %c0_57 = arith.constant 0 : index
    %126 = vector.load %arg15[%c0_55, %c0_56, %c0_57] : memref<2x1x32xf32, #tpu.memory_space<vmem>>, vector<1x1x32xf32>
    %127 = vector.shape_cast %126 : vector<1x1x32xf32> to vector<1x32xf32>
    %c0_58 = arith.constant 0 : index
    %c0_59 = arith.constant 0 : index
    %c0_60 = arith.constant 0 : index
    %128 = vector.load %arg16[%c0_58, %c0_59, %c0_60] : memref<2x1x32xf32, #tpu.memory_space<vmem>>, vector<1x1x32xf32>
    %129 = vector.shape_cast %128 : vector<1x1x32xf32> to vector<1x32xf32>
    %cst_61 = arith.constant dense<0.000000e+00> : vector<16xf32>
    %130 = vector.multi_reduction <add>, %125, %cst_61 [1] : vector<16x32xf32> to vector<16xf32>
    %131 = vector.shape_cast %130 : vector<16xf32> to vector<16x1xf32>
    %cst_62 = arith.constant 3.200000e+01 : f32
    %132 = vector.broadcast %cst_62 : f32 to vector<16x1xf32>
    %133 = arith.divf %131, %132 : vector<16x1xf32>
    %134 = vector.broadcast %133 : vector<16x1xf32> to vector<16x32xf32>
    %135 = arith.subf %125, %134 : vector<16x32xf32>
    %136 = arith.mulf %135, %135 : vector<16x32xf32>
    %cst_63 = arith.constant dense<0.000000e+00> : vector<16xf32>
    %137 = vector.multi_reduction <add>, %136, %cst_63 [1] : vector<16x32xf32> to vector<16xf32>
    %138 = vector.shape_cast %137 : vector<16xf32> to vector<16x1xf32>
    %cst_64 = arith.constant 3.200000e+01 : f32
    %139 = vector.broadcast %cst_64 : f32 to vector<16x1xf32>
    %140 = arith.divf %138, %139 : vector<16x1xf32>
    %cst_65 = arith.constant 9.99999974E-6 : f32
    %141 = vector.broadcast %cst_65 : f32 to vector<16x1xf32>
    %142 = arith.addf %140, %141 : vector<16x1xf32>
    %143 = math.rsqrt %142 : vector<16x1xf32>
    %144 = vector.broadcast %143 : vector<16x1xf32> to vector<16x32xf32>
    %145 = arith.mulf %135, %144 : vector<16x32xf32>
    %146 = vector.broadcast %127 : vector<1x32xf32> to vector<16x32xf32>
    %147 = arith.mulf %145, %146 : vector<16x32xf32>
    %148 = vector.broadcast %129 : vector<1x32xf32> to vector<16x32xf32>
    %149 = arith.addf %147, %148 : vector<16x32xf32>
    %c1 = arith.constant 1 : index
    %c0_66 = arith.constant 0 : index
    %c0_67 = arith.constant 0 : index
    %150 = vector.load %arg5[%c1, %c0_66, %c0_67] : memref<2x32x96xf32, #tpu.memory_space<vmem>>, vector<1x32x96xf32>
    %151 = vector.shape_cast %150 : vector<1x32x96xf32> to vector<32x96xf32>
    %cst_68 = arith.constant dense<0.000000e+00> : vector<16x96xf32>
    %152 = tpu.matmul %149, %151, %cst_68 {dimension_numbers = #tpu.dot_dimension_numbers<[1], [0], [0], [1], [0, 0, 1, 1], [], []>} : vector<16x32xf32>, vector<32x96xf32>, vector<16x96xf32> -> vector<16x96xf32>
    %c1_69 = arith.constant 1 : index
    %c0_70 = arith.constant 0 : index
    %c0_71 = arith.constant 0 : index
    %153 = vector.load %arg6[%c1_69, %c0_70, %c0_71] : memref<2x1x96xf32, #tpu.memory_space<vmem>>, vector<1x1x96xf32>
    %154 = vector.shape_cast %153 : vector<1x1x96xf32> to vector<1x96xf32>
    %155 = vector.broadcast %154 : vector<1x96xf32> to vector<16x96xf32>
    %156 = arith.addf %152, %155 : vector<16x96xf32>
    %157 = vector.extract_strided_slice %156 {offsets = [0, 0], sizes = [16, 8], strides = [1, 1]} : vector<16x96xf32> to vector<16x8xf32>
    %158 = vector.shape_cast %157 : vector<16x8xf32> to vector<2x8x8xf32>
    %159 = vector.extract_strided_slice %156 {offsets = [0, 32], sizes = [16, 8], strides = [1, 1]} : vector<16x96xf32> to vector<16x8xf32>
    %160 = vector.shape_cast %159 : vector<16x8xf32> to vector<2x8x8xf32>
    %161 = vector.extract_strided_slice %156 {offsets = [0, 64], sizes = [16, 8], strides = [1, 1]} : vector<16x96xf32> to vector<16x8xf32>
    %162 = vector.shape_cast %161 : vector<16x8xf32> to vector<2x8x8xf32>
    %163 = vector.extract_strided_slice %156 {offsets = [0, 8], sizes = [16, 8], strides = [1, 1]} : vector<16x96xf32> to vector<16x8xf32>
    %164 = vector.shape_cast %163 : vector<16x8xf32> to vector<2x8x8xf32>
    %165 = vector.extract_strided_slice %156 {offsets = [0, 40], sizes = [16, 8], strides = [1, 1]} : vector<16x96xf32> to vector<16x8xf32>
    %166 = vector.shape_cast %165 : vector<16x8xf32> to vector<2x8x8xf32>
    %167 = vector.extract_strided_slice %156 {offsets = [0, 72], sizes = [16, 8], strides = [1, 1]} : vector<16x96xf32> to vector<16x8xf32>
    %168 = vector.shape_cast %167 : vector<16x8xf32> to vector<2x8x8xf32>
    %169 = vector.extract_strided_slice %156 {offsets = [0, 16], sizes = [16, 8], strides = [1, 1]} : vector<16x96xf32> to vector<16x8xf32>
    %170 = vector.shape_cast %169 : vector<16x8xf32> to vector<2x8x8xf32>
    %171 = vector.extract_strided_slice %156 {offsets = [0, 48], sizes = [16, 8], strides = [1, 1]} : vector<16x96xf32> to vector<16x8xf32>
    %172 = vector.shape_cast %171 : vector<16x8xf32> to vector<2x8x8xf32>
    %173 = vector.extract_strided_slice %156 {offsets = [0, 80], sizes = [16, 8], strides = [1, 1]} : vector<16x96xf32> to vector<16x8xf32>
    %174 = vector.shape_cast %173 : vector<16x8xf32> to vector<2x8x8xf32>
    %175 = vector.extract_strided_slice %156 {offsets = [0, 24], sizes = [16, 8], strides = [1, 1]} : vector<16x96xf32> to vector<16x8xf32>
    %176 = vector.shape_cast %175 : vector<16x8xf32> to vector<2x8x8xf32>
    %177 = vector.extract_strided_slice %156 {offsets = [0, 56], sizes = [16, 8], strides = [1, 1]} : vector<16x96xf32> to vector<16x8xf32>
    %178 = vector.shape_cast %177 : vector<16x8xf32> to vector<2x8x8xf32>
    %179 = vector.extract_strided_slice %156 {offsets = [0, 88], sizes = [16, 8], strides = [1, 1]} : vector<16x96xf32> to vector<16x8xf32>
    %180 = vector.shape_cast %179 : vector<16x8xf32> to vector<2x8x8xf32>
    %181 = tpu.concatenate %158, %164, %170, %176 in 0 : vector<2x8x8xf32>, vector<2x8x8xf32>, vector<2x8x8xf32>, vector<2x8x8xf32> -> vector<8x8x8xf32>
    %182 = tpu.concatenate %160, %166, %172, %178 in 0 : vector<2x8x8xf32>, vector<2x8x8xf32>, vector<2x8x8xf32>, vector<2x8x8xf32> -> vector<8x8x8xf32>
    %183 = tpu.concatenate %162, %168, %174, %180 in 0 : vector<2x8x8xf32>, vector<2x8x8xf32>, vector<2x8x8xf32>, vector<2x8x8xf32> -> vector<8x8x8xf32>
    "tpu.trace_start"() <{level = 10 : i32, message = "bqd,bkd->bqk"}> : () -> ()
    %cst_72 = arith.constant dense<0.000000e+00> : vector<8x8x8xf32>
    %184 = tpu.matmul %181, %182, %cst_72 {dimension_numbers = #tpu.dot_dimension_numbers<[2], [2], [1], [1], [0, 0, 0, 1, 1, 1], [0], [0]>} : vector<8x8x8xf32>, vector<8x8x8xf32>, vector<8x8x8xf32> -> vector<8x8x8xf32>
    "tpu.trace_stop"() : () -> ()
    %cst_73 = arith.constant 0.353553385 : f32
    %185 = vector.broadcast %cst_73 : f32 to vector<8x8x8xf32>
    %186 = arith.mulf %184, %185 : vector<8x8x8xf32>
    %cst_74 = arith.constant dense<0xFF800000> : vector<8x8xf32>
    %187 = vector.multi_reduction <maximumf>, %186, %cst_74 [2] : vector<8x8x8xf32> to vector<8x8xf32>
    %188 = vector.shape_cast %187 : vector<8x8xf32> to vector<8x8x1xf32>
    %189 = vector.broadcast %188 : vector<8x8x1xf32> to vector<8x8x8xf32>
    %190 = arith.subf %186, %189 : vector<8x8x8xf32>
    %191 = math.exp %190 : vector<8x8x8xf32>
    %cst_75 = arith.constant dense<0.000000e+00> : vector<8x8xf32>
    %192 = vector.multi_reduction <add>, %191, %cst_75 [2] : vector<8x8x8xf32> to vector<8x8xf32>
    %193 = vector.shape_cast %192 : vector<8x8xf32> to vector<8x8x1xf32>
    %194 = tpu.reciprocal %193 {approx = true} : vector<8x8x1xf32> -> vector<8x8x1xf32>
    %195 = vector.broadcast %194 : vector<8x8x1xf32> to vector<8x8x8xf32>
    %196 = arith.mulf %191, %195 : vector<8x8x8xf32>
    "tpu.trace_start"() <{level = 10 : i32, message = "bqk,bkd->bqd"}> : () -> ()
    %cst_76 = arith.constant dense<0.000000e+00> : vector<8x8x8xf32>
    %197 = tpu.matmul %196, %183, %cst_76 {dimension_numbers = #tpu.dot_dimension_numbers<[2], [1], [1], [2], [0, 0, 0, 1, 1, 2], [0], [0]>} : vector<8x8x8xf32>, vector<8x8x8xf32>, vector<8x8x8xf32> -> vector<8x8x8xf32>
    "tpu.trace_stop"() : () -> ()
    %198 = vector.extract_strided_slice %197 {offsets = [0, 0, 0], sizes = [2, 8, 8], strides = [1, 1, 1]} : vector<8x8x8xf32> to vector<2x8x8xf32>
    %199 = vector.shape_cast %198 : vector<2x8x8xf32> to vector<16x8xf32>
    %200 = vector.extract_strided_slice %197 {offsets = [2, 0, 0], sizes = [2, 8, 8], strides = [1, 1, 1]} : vector<8x8x8xf32> to vector<2x8x8xf32>
    %201 = vector.shape_cast %200 : vector<2x8x8xf32> to vector<16x8xf32>
    %202 = vector.extract_strided_slice %197 {offsets = [4, 0, 0], sizes = [2, 8, 8], strides = [1, 1, 1]} : vector<8x8x8xf32> to vector<2x8x8xf32>
    %203 = vector.shape_cast %202 : vector<2x8x8xf32> to vector<16x8xf32>
    %204 = vector.extract_strided_slice %197 {offsets = [6, 0, 0], sizes = [2, 8, 8], strides = [1, 1, 1]} : vector<8x8x8xf32> to vector<2x8x8xf32>
    %205 = vector.shape_cast %204 : vector<2x8x8xf32> to vector<16x8xf32>
    %206 = tpu.concatenate %199, %201, %203, %205 in 1 : vector<16x8xf32>, vector<16x8xf32>, vector<16x8xf32>, vector<16x8xf32> -> vector<16x32xf32>
    %c1_77 = arith.constant 1 : index
    %c0_78 = arith.constant 0 : index
    %c0_79 = arith.constant 0 : index
    %207 = vector.load %arg7[%c1_77, %c0_78, %c0_79] : memref<2x32x32xf32, #tpu.memory_space<vmem>>, vector<1x32x32xf32>
    %208 = vector.shape_cast %207 : vector<1x32x32xf32> to vector<32x32xf32>
    %cst_80 = arith.constant dense<0.000000e+00> : vector<16x32xf32>
    %209 = tpu.matmul %206, %208, %cst_80 {dimension_numbers = #tpu.dot_dimension_numbers<[1], [0], [0], [1], [0, 0, 1, 1], [], []>} : vector<16x32xf32>, vector<32x32xf32>, vector<16x32xf32> -> vector<16x32xf32>
    %c1_81 = arith.constant 1 : index
    %c0_82 = arith.constant 0 : index
    %c0_83 = arith.constant 0 : index
    %210 = vector.load %arg8[%c1_81, %c0_82, %c0_83] : memref<2x1x32xf32, #tpu.memory_space<vmem>>, vector<1x1x32xf32>
    %211 = vector.shape_cast %210 : vector<1x1x32xf32> to vector<1x32xf32>
    %212 = vector.broadcast %211 : vector<1x32xf32> to vector<16x32xf32>
    %213 = arith.addf %209, %212 : vector<16x32xf32>
    %214 = arith.addf %149, %213 : vector<16x32xf32>
    %c1_84 = arith.constant 1 : index
    %c0_85 = arith.constant 0 : index
    %c0_86 = arith.constant 0 : index
    %215 = vector.load %arg13[%c1_84, %c0_85, %c0_86] : memref<2x1x32xf32, #tpu.memory_space<vmem>>, vector<1x1x32xf32>
    %216 = vector.shape_cast %215 : vector<1x1x32xf32> to vector<1x32xf32>
    %c1_87 = arith.constant 1 : index
    %c0_88 = arith.constant 0 : index
    %c0_89 = arith.constant 0 : index
    %217 = vector.load %arg14[%c1_87, %c0_88, %c0_89] : memref<2x1x32xf32, #tpu.memory_space<vmem>>, vector<1x1x32xf32>
    %218 = vector.shape_cast %217 : vector<1x1x32xf32> to vector<1x32xf32>
    %cst_90 = arith.constant dense<0.000000e+00> : vector<16xf32>
    %219 = vector.multi_reduction <add>, %214, %cst_90 [1] : vector<16x32xf32> to vector<16xf32>
    %220 = vector.shape_cast %219 : vector<16xf32> to vector<16x1xf32>
    %cst_91 = arith.constant 3.200000e+01 : f32
    %221 = vector.broadcast %cst_91 : f32 to vector<16x1xf32>
    %222 = arith.divf %220, %221 : vector<16x1xf32>
    %223 = vector.broadcast %222 : vector<16x1xf32> to vector<16x32xf32>
    %224 = arith.subf %214, %223 : vector<16x32xf32>
    %225 = arith.mulf %224, %224 : vector<16x32xf32>
    %cst_92 = arith.constant dense<0.000000e+00> : vector<16xf32>
    %226 = vector.multi_reduction <add>, %225, %cst_92 [1] : vector<16x32xf32> to vector<16xf32>
    %227 = vector.shape_cast %226 : vector<16xf32> to vector<16x1xf32>
    %cst_93 = arith.constant 3.200000e+01 : f32
    %228 = vector.broadcast %cst_93 : f32 to vector<16x1xf32>
    %229 = arith.divf %227, %228 : vector<16x1xf32>
    %cst_94 = arith.constant 9.99999974E-6 : f32
    %230 = vector.broadcast %cst_94 : f32 to vector<16x1xf32>
    %231 = arith.addf %229, %230 : vector<16x1xf32>
    %232 = math.rsqrt %231 : vector<16x1xf32>
    %233 = vector.broadcast %232 : vector<16x1xf32> to vector<16x32xf32>
    %234 = arith.mulf %224, %233 : vector<16x32xf32>
    %235 = vector.broadcast %216 : vector<1x32xf32> to vector<16x32xf32>
    %236 = arith.mulf %234, %235 : vector<16x32xf32>
    %237 = vector.broadcast %218 : vector<1x32xf32> to vector<16x32xf32>
    %238 = arith.addf %236, %237 : vector<16x32xf32>
    %c1_95 = arith.constant 1 : index
    %c0_96 = arith.constant 0 : index
    %c0_97 = arith.constant 0 : index
    %239 = vector.load %arg9[%c1_95, %c0_96, %c0_97] : memref<2x32x64xf32, #tpu.memory_space<vmem>>, vector<1x32x64xf32>
    %240 = vector.shape_cast %239 : vector<1x32x64xf32> to vector<32x64xf32>
    %cst_98 = arith.constant dense<0.000000e+00> : vector<16x64xf32>
    %241 = tpu.matmul %238, %240, %cst_98 {dimension_numbers = #tpu.dot_dimension_numbers<[1], [0], [0], [1], [0, 0, 1, 1], [], []>} : vector<16x32xf32>, vector<32x64xf32>, vector<16x64xf32> -> vector<16x64xf32>
    %c1_99 = arith.constant 1 : index
    %c0_100 = arith.constant 0 : index
    %c0_101 = arith.constant 0 : index
    %242 = vector.load %arg10[%c1_99, %c0_100, %c0_101] : memref<2x1x64xf32, #tpu.memory_space<vmem>>, vector<1x1x64xf32>
    %243 = vector.shape_cast %242 : vector<1x1x64xf32> to vector<1x64xf32>
    %244 = vector.broadcast %243 : vector<1x64xf32> to vector<16x64xf32>
    %245 = arith.addf %241, %244 : vector<16x64xf32>
    %cst_102 = arith.constant 5.000000e-01 : f32
    %246 = vector.broadcast %cst_102 : f32 to vector<16x64xf32>
    %247 = arith.mulf %246, %245 : vector<16x64xf32>
    %cst_103 = arith.constant 0.707106769 : f32
    %248 = vector.broadcast %cst_103 : f32 to vector<16x64xf32>
    %249 = arith.mulf %245, %248 : vector<16x64xf32>
    %250 = math.erf %249 : vector<16x64xf32>
    %cst_104 = arith.constant 1.000000e+00 : f32
    %251 = vector.broadcast %cst_104 : f32 to vector<16x64xf32>
    %252 = arith.addf %251, %250 : vector<16x64xf32>
    %253 = arith.mulf %247, %252 : vector<16x64xf32>
    %c1_105 = arith.constant 1 : index
    %c0_106 = arith.constant 0 : index
    %c0_107 = arith.constant 0 : index
    %254 = vector.load %arg11[%c1_105, %c0_106, %c0_107] : memref<2x64x32xf32, #tpu.memory_space<vmem>>, vector<1x64x32xf32>
    %255 = vector.shape_cast %254 : vector<1x64x32xf32> to vector<64x32xf32>
    %cst_108 = arith.constant dense<0.000000e+00> : vector<16x32xf32>
    %256 = tpu.matmul %253, %255, %cst_108 {dimension_numbers = #tpu.dot_dimension_numbers<[1], [0], [0], [1], [0, 0, 1, 1], [], []>} : vector<16x64xf32>, vector<64x32xf32>, vector<16x32xf32> -> vector<16x32xf32>
    %c1_109 = arith.constant 1 : index
    %c0_110 = arith.constant 0 : index
    %c0_111 = arith.constant 0 : index
    %257 = vector.load %arg12[%c1_109, %c0_110, %c0_111] : memref<2x1x32xf32, #tpu.memory_space<vmem>>, vector<1x1x32xf32>
    %258 = vector.shape_cast %257 : vector<1x1x32xf32> to vector<1x32xf32>
    %259 = vector.broadcast %258 : vector<1x32xf32> to vector<16x32xf32>
    %260 = arith.addf %256, %259 : vector<16x32xf32>
    %261 = arith.addf %238, %260 : vector<16x32xf32>
    %c1_112 = arith.constant 1 : index
    %c0_113 = arith.constant 0 : index
    %c0_114 = arith.constant 0 : index
    %262 = vector.load %arg15[%c1_112, %c0_113, %c0_114] : memref<2x1x32xf32, #tpu.memory_space<vmem>>, vector<1x1x32xf32>
    %263 = vector.shape_cast %262 : vector<1x1x32xf32> to vector<1x32xf32>
    %c1_115 = arith.constant 1 : index
    %c0_116 = arith.constant 0 : index
    %c0_117 = arith.constant 0 : index
    %264 = vector.load %arg16[%c1_115, %c0_116, %c0_117] : memref<2x1x32xf32, #tpu.memory_space<vmem>>, vector<1x1x32xf32>
    %265 = vector.shape_cast %264 : vector<1x1x32xf32> to vector<1x32xf32>
    %cst_118 = arith.constant dense<0.000000e+00> : vector<16xf32>
    %266 = vector.multi_reduction <add>, %261, %cst_118 [1] : vector<16x32xf32> to vector<16xf32>
    %267 = vector.shape_cast %266 : vector<16xf32> to vector<16x1xf32>
    %cst_119 = arith.constant 3.200000e+01 : f32
    %268 = vector.broadcast %cst_119 : f32 to vector<16x1xf32>
    %269 = arith.divf %267, %268 : vector<16x1xf32>
    %270 = vector.broadcast %269 : vector<16x1xf32> to vector<16x32xf32>
    %271 = arith.subf %261, %270 : vector<16x32xf32>
    %272 = arith.mulf %271, %271 : vector<16x32xf32>
    %cst_120 = arith.constant dense<0.000000e+00> : vector<16xf32>
    %273 = vector.multi_reduction <add>, %272, %cst_120 [1] : vector<16x32xf32> to vector<16xf32>
    %274 = vector.shape_cast %273 : vector<16xf32> to vector<16x1xf32>
    %cst_121 = arith.constant 3.200000e+01 : f32
    %275 = vector.broadcast %cst_121 : f32 to vector<16x1xf32>
    %276 = arith.divf %274, %275 : vector<16x1xf32>
    %cst_122 = arith.constant 9.99999974E-6 : f32
    %277 = vector.broadcast %cst_122 : f32 to vector<16x1xf32>
    %278 = arith.addf %276, %277 : vector<16x1xf32>
    %279 = math.rsqrt %278 : vector<16x1xf32>
    %280 = vector.broadcast %279 : vector<16x1xf32> to vector<16x32xf32>
    %281 = arith.mulf %271, %280 : vector<16x32xf32>
    %282 = vector.broadcast %263 : vector<1x32xf32> to vector<16x32xf32>
    %283 = arith.mulf %281, %282 : vector<16x32xf32>
    %284 = vector.broadcast %265 : vector<1x32xf32> to vector<16x32xf32>
    %285 = arith.addf %283, %284 : vector<16x32xf32>
    %cst_123 = arith.constant 0.00999999977 : f32
    %286 = vector.broadcast %cst_123 : f32 to vector<16x32xf32>
    %287 = arith.mulf %286, %285 : vector<16x32xf32>
    %288 = arith.maximumf %285, %287 : vector<16x32xf32>
    %c0_124 = arith.constant 0 : index
    %c0_125 = arith.constant 0 : index
    %289 = vector.load %arg17[%c0_124, %c0_125] : memref<32x128xf32, #tpu.memory_space<vmem>>, vector<32x128xf32>
    %cst_126 = arith.constant dense<0.000000e+00> : vector<16x128xf32>
    %290 = tpu.matmul %288, %289, %cst_126 {dimension_numbers = #tpu.dot_dimension_numbers<[1], [0], [0], [1], [0, 0, 1, 1], [], []>} : vector<16x32xf32>, vector<32x128xf32>, vector<16x128xf32> -> vector<16x128xf32>
    %c0_127 = arith.constant 0 : index
    %c0_128 = arith.constant 0 : index
    %291 = vector.load %arg18[%c0_127, %c0_128] : memref<1x128xf32, #tpu.memory_space<vmem>>, vector<1x128xf32>
    %292 = vector.broadcast %291 : vector<1x128xf32> to vector<16x128xf32>
    %293 = arith.addf %290, %292 : vector<16x128xf32>
    %c0_129 = arith.constant 0 : index
    %c0_130 = arith.constant 0 : index
    %294 = vector.load %arg19[%c0_129, %c0_130] : memref<16x128xf32, #tpu.memory_space<vmem>>, vector<16x128xf32>
    tpu.vector_store %arg19[%c0_129, %c0_130], %293 {strides = array<i32>} : memref<16x128xf32, #tpu.memory_space<vmem>>, vector<16x128xf32>,
    return
  }
  func.func @transform_0(%arg0: i32) -> (i32, i32) {
    %c0_i32 = arith.constant 0 : i32
    %c0_i32_0 = arith.constant 0 : i32
    %c0_i32_1 = arith.constant 0 : i32
    return %c0_i32, %c0_i32_0 : i32, i32
  }
  func.func @transform_1(%arg0: i32) -> (i32, i32) {
    %c0_i32 = arith.constant 0 : i32
    %c0_i32_0 = arith.constant 0 : i32
    %c0_i32_1 = arith.constant 0 : i32
    return %c0_i32, %c0_i32_0 : i32, i32
  }
  func.func @transform_2(%arg0: i32) -> (i32, i32) {
    %c0_i32 = arith.constant 0 : i32
    %c0_i32_0 = arith.constant 0 : i32
    %c0_i32_1 = arith.constant 0 : i32
    return %c0_i32, %c0_i32_0 : i32, i32
  }
  func.func @transform_3(%arg0: i32) -> (i32, i32) {
    %c0_i32 = arith.constant 0 : i32
    %c0_i32_0 = arith.constant 0 : i32
    %c0_i32_1 = arith.constant 0 : i32
    return %c0_i32, %c0_i32_0 : i32, i32
  }
  func.func @transform_4(%arg0: i32) -> (i32, i32, i32) {
    %c0_i32 = arith.constant 0 : i32
    %c0_i32_0 = arith.constant 0 : i32
    %c0_i32_1 = arith.constant 0 : i32
    %c0_i32_2 = arith.constant 0 : i32
    return %c0_i32, %c0_i32_0, %c0_i32_1 : i32, i32, i32
  }
  func.func @transform_5(%arg0: i32) -> (i32, i32, i32) {
    %c0_i32 = arith.constant 0 : i32
    %c0_i32_0 = arith.constant 0 : i32
    %c0_i32_1 = arith.constant 0 : i32
    %c0_i32_2 = arith.constant 0 : i32
    return %c0_i32, %c0_i32_0, %c0_i32_1 : i32, i32, i32
  }
  func.func @transform_6(%arg0: i32) -> (i32, i32, i32) {
    %c0_i32 = arith.constant 0 : i32
    %c0_i32_0 = arith.constant 0 : i32
    %c0_i32_1 = arith.constant 0 : i32
    %c0_i32_2 = arith.constant 0 : i32
    return %c0_i32, %c0_i32_0, %c0_i32_1 : i32, i32, i32
  }
  func.func @transform_7(%arg0: i32) -> (i32, i32, i32) {
    %c0_i32 = arith.constant 0 : i32
    %c0_i32_0 = arith.constant 0 : i32
    %c0_i32_1 = arith.constant 0 : i32
    %c0_i32_2 = arith.constant 0 : i32
    return %c0_i32, %c0_i32_0, %c0_i32_1 : i32, i32, i32
  }
  func.func @transform_8(%arg0: i32) -> (i32, i32, i32) {
    %c0_i32 = arith.constant 0 : i32
    %c0_i32_0 = arith.constant 0 : i32
    %c0_i32_1 = arith.constant 0 : i32
    %c0_i32_2 = arith.constant 0 : i32
    return %c0_i32, %c0_i32_0, %c0_i32_1 : i32, i32, i32
  }
  func.func @transform_9(%arg0: i32) -> (i32, i32, i32) {
    %c0_i32 = arith.constant 0 : i32
    %c0_i32_0 = arith.constant 0 : i32
    %c0_i32_1 = arith.constant 0 : i32
    %c0_i32_2 = arith.constant 0 : i32
    return %c0_i32, %c0_i32_0, %c0_i32_1 : i32, i32, i32
  }
  func.func @transform_10(%arg0: i32) -> (i32, i32, i32) {
    %c0_i32 = arith.constant 0 : i32
    %c0_i32_0 = arith.constant 0 : i32
    %c0_i32_1 = arith.constant 0 : i32
    %c0_i32_2 = arith.constant 0 : i32
    return %c0_i32, %c0_i32_0, %c0_i32_1 : i32, i32, i32
  }
  func.func @transform_11(%arg0: i32) -> (i32, i32, i32) {
    %c0_i32 = arith.constant 0 : i32
    %c0_i32_0 = arith.constant 0 : i32
    %c0_i32_1 = arith.constant 0 : i32
    %c0_i32_2 = arith.constant 0 : i32
    return %c0_i32, %c0_i32_0, %c0_i32_1 : i32, i32, i32
  }
  func.func @transform_12(%arg0: i32) -> (i32, i32, i32) {
    %c0_i32 = arith.constant 0 : i32
    %c0_i32_0 = arith.constant 0 : i32
    %c0_i32_1 = arith.constant 0 : i32
    %c0_i32_2 = arith.constant 0 : i32
    return %c0_i32, %c0_i32_0, %c0_i32_1 : i32, i32, i32
  }
  func.func @transform_13(%arg0: i32) -> (i32, i32, i32) {
    %c0_i32 = arith.constant 0 : i32
    %c0_i32_0 = arith.constant 0 : i32
    %c0_i32_1 = arith.constant 0 : i32
    %c0_i32_2 = arith.constant 0 : i32
    return %c0_i32, %c0_i32_0, %c0_i32_1 : i32, i32, i32
  }
  func.func @transform_14(%arg0: i32) -> (i32, i32, i32) {
    %c0_i32 = arith.constant 0 : i32
    %c0_i32_0 = arith.constant 0 : i32
    %c0_i32_1 = arith.constant 0 : i32
    %c0_i32_2 = arith.constant 0 : i32
    return %c0_i32, %c0_i32_0, %c0_i32_1 : i32, i32, i32
  }
  func.func @transform_15(%arg0: i32) -> (i32, i32, i32) {
    %c0_i32 = arith.constant 0 : i32
    %c0_i32_0 = arith.constant 0 : i32
    %c0_i32_1 = arith.constant 0 : i32
    %c0_i32_2 = arith.constant 0 : i32
    return %c0_i32, %c0_i32_0, %c0_i32_1 : i32, i32, i32
  }
  func.func @transform_16(%arg0: i32) -> (i32, i32) {
    %c0_i32 = arith.constant 0 : i32
    %c0_i32_0 = arith.constant 0 : i32
    %c0_i32_1 = arith.constant 0 : i32
    return %c0_i32, %c0_i32_0 : i32, i32
  }
  func.func @transform_17(%arg0: i32) -> (i32, i32) {
    %c0_i32 = arith.constant 0 : i32
    %c0_i32_0 = arith.constant 0 : i32
    %c0_i32_1 = arith.constant 0 : i32
    return %c0_i32, %c0_i32_0 : i32, i32
  }
  func.func @transform_18(%arg0: i32) -> (i32, i32) {
    %c0_i32 = arith.constant 0 : i32
    %c0_i32_0 = arith.constant 0 : i32
    %c0_i32_1 = arith.constant 0 : i32
    return %c0_i32, %c0_i32_0 : i32, i32
  }
}

</mosaic_0001>

<bundles_post_ra>
// kernel: ts_transformer_forward.1
= control target key start
LH: loop header
LB: loop body
LE: loop exit
PB: predicated region body
PF: predicated region fallthrough
CT: control target
= control target key end

     0   :  { %s5415_s0 = inlined_call_operand.vmem [shape: f32[16,8], index: 0, kind: input, shape index: {}]   ;;  %s5416_s1 = inlined_call_operand.vmem [shape: f32[8,32], index: 1, kind: input, shape index: {}]   ;;  %s5417_s2 = inlined_call_operand.vmem [shape: f32[8,32], index: 2, kind: input, shape index: {}]   ;;  %s5418_s3 = inlined_call_operand.vmem [shape: f32[1,32], index: 3, kind: input, shape index: {}]   ;;  %s5419_s4 = inlined_call_operand.vmem [shape: f32[2,32,96], index: 4, kind: input, shape index: {}]   ;;  %s5420_s5 = inlined_call_operand.vmem [shape: f32[2,1,96], index: 5, kind: input, shape index: {}]   ;;  %s5421_s6 = inlined_call_operand.vmem [shape: f32[2,32,32], index: 6, kind: input, shape index: {}]   ;;  %s5422_s7 = inlined_call_operand.vmem [shape: f32[2,1,32], index: 7, kind: input, shape index: {}]   ;;  %s5423_s8 = inlined_call_operand.vmem [shape: f32[2,32,64], index: 8, kind: input, shape index: {}]   ;;  %s5424_s9 = inlined_call_operand.vmem [shape: f32[2,1,64], index: 9, kind: input, shape index: {}]   ;;  %s5425_s10 = inlined_call_operand.vmem [shape: f32[2,64,32], index: 10, kind: input, shape index: {}]   ;;  %s5426_s11 = inlined_call_operand.vmem [shape: f32[2,1,32], index: 11, kind: input, shape index: {}]   ;;  %s5427_s12 = inlined_call_operand.vmem [shape: f32[2,1,32], index: 12, kind: input, shape index: {}]   ;;  %s5428_s13 = inlined_call_operand.vmem [shape: f32[2,1,32], index: 13, kind: input, shape index: {}]   ;;  %s5429_s14 = inlined_call_operand.vmem [shape: f32[2,1,32], index: 14, kind: input, shape index: {}]   ;;  %s5430_s15 = inlined_call_operand.hbm [shape: f32[2,1,32], index: 15, kind: input, shape index: {}]   ;;  %s5431_s16 = inlined_call_operand.vmem [shape: f32[32,128], index: 16, kind: input, shape index: {}]   ;;  %s5432_s17 = inlined_call_operand.vmem [shape: f32[1,128], index: 17, kind: input, shape index: {}]   ;;  %s5433_s18 = inlined_call_operand.vmem [shape: f32[16,128], index: 18, kind: output, shape index: {}]  }
   0x1   :  { %5435 = sst [smem:[#allocation5_spill]] %s5415_s0 }
   0x2   :  { %5436 = sst [smem:[#allocation6_spill]] %s5416_s1 }
   0x3   :  { %5437 = sst [smem:[#allocation7_spill]] %s5417_s2 }
   0x4   :  { %23 = vsyncpa [#allocation3], 0  ;;  %s4684_s27 = smov [#allocation2]   ;;  %s4660_s0 = scalar_lea.hbm %s5430_s15, 32 }
   0x5   :  { %s59_s28 = sshll.u32 %s4684_s27, 4  ;;  %p4661_p0 = scmp.ne.s32.totalorder %s5430_s15, %s4660_s0  ;;  %s60_s28 = int_to_ptr.vmem [resolvable:$true] %s59_s28 }
   0x6   :  { %p4664_p1 = scmp.lt.u32.totalorder %s4660_s0, %s5430_s15 }
   0x8   :  { %p4666_p2 = pnand %p4664_p1, %p4661_p0 }
   0xa   :  { %4669 = shalt.err (!%p4666_p2)
}
   0xb   :  { %s4670_s22 = scalar_lea.vmem %s60_s28, 32  ;;  %p4675_p4 = scmp.lt.s32.totalorder %s60_s28, %s60_s28 }
   0xc   :  { %p4671_p3 = scmp.ne.s32.totalorder %s60_s28, %s4670_s22  ;;  %p4676_p5 = scmp.lt.s32.totalorder %s4670_s22, %s4670_s22 }
   0xe   :  { %p4677_p6 = por %p4676_p5, %p4675_p4 }
  0x10   :  { %p4678_p7 = pnand %p4677_p6, %p4671_p3 }
  0x12   :  { %4681 = shalt.err (!%p4678_p7)
}
  0x13   :  { %s4685_s2 = smov 16   ;;  %s4686_s23 = smov 1  }
  0x14   :  { %65 = dma.hbm_to_vmem [thread:$0]  %s5430_s15, 32, %s60_s28, [#allocation3], %s4685_s2, %s4685_s2, %s4686_s23  }
  0x15   :  { %4682 = dma.done.wait [#allocation3], 32  }
  0x16   :  { %4683 = vsyncadd [#allocation3], 4294967264  ;;  %vm83_vm0 = vcmask 64512   ;;  %s5438_s29 = sld [smem:[#allocation7_spill]]  ;;  %s5439_s19 = sld [smem:[#allocation5_spill]]  ;;  %v170_v3 = vld [vmem:[%s5419_s4] sm:$0xff] }
  0x17   :  { %v171_v4 = vld [vmem:[%s5419_s4 + $0x8] sm:$0xff]  ;;  %v172_v6 = vld [vmem:[%s5419_s4 + $0x10] sm:$0xff]  ;;  %v173_v7 = vld [vmem:[%s5419_s4 + $0x18] sm:$0xff]  ;;  %vm181_vm1 = vcmask 261120   ;;  %v4687_v21 = vmov 0.0   ;;  %s4688_s20 = smov 112  }
  0x18   :  { %v4472_v5 = vpack.c.bf16 %v171_v4, %v170_v3  ;;  %v4476_v8 = vpack.c.bf16 %v173_v7, %v172_v6  ;;  %v3950_v9 = vld [vmem:[%s5418_s3] ss:$0 sm:$0xff]  ;;  %s4689_s15 = smov 120   ;;  %vm4690_vm2 = vmmov 0   ;;  %s4691_s28 = smov 104   ;;  %vm1615_vm3 = vcmask 130048  }
  0x19   :  { %v3953_v19 = vld [vmem:[%s5420_s5] ss:$0 sm:$0xff]  ;;  %s4692_s21 = smov 96   ;;  %s4693_s22 = smov 64   ;;  %vm1618_vm4 = vcmask 195584   ;;  %vm1877_vm5 = vcmask 523264  }
  0x1a   :  { %4473 = vmatprep.subr.bf16.mxu1 %v4472_v5  ;;  %s4695_s3 = smov 24  }
  0x1b   :  { %4475 = vmatpush3.bf16.msra.mxu1 %v4472_v5 }
  0x1c   :  { %v75_v0 = vld [vmem:[%s5438_s29] sm:$0xff]  ;;  %v74_v2 = vld [vmem:[%s5439_s19 + $0x8] sm:$0xff]  ;;  %4477 = vmatprep.subr.bf16.mxu1 %v4476_v8 }
  0x1d   :  { %v73_v1 = vld [vmem:[%s5439_s19] sm:$0xff]  ;;  %4192 = vmatprep.subr.mxu0 %v75_v0  ;;  %s5440_s19 = sld [smem:[#allocation6_spill]] }
  0x1e   :  { %4194 = vmatprep.mubr.msk.f32.mxu0 %vm83_vm0, %v73_v1  ;;  %4193 = vmatpush3.msra.mxu0 %v75_v0 }
  0x1f   :  { %4195 = vmatmul.mubr.msk.f32.vlgmr.msra.gmra.mrb[0].mxu0 %vm83_vm0, %v74_v2  ;;  %4479 = vmatpush3.bf16.msra.mxu1 %v4476_v8 }
  0x20   :  { %4208 = vmatprep.subr.mxu0 %v4687_v21  ;;  %4228 = vmatprep.subr.mxu1 %v4687_v21 }
  0x21   :  { %4210 = vmatprep.mubr.msk.f32.mxu0 %vm4690_vm2, %v4687_v21 }
  0x23   :  { %v167_v15 = vld [vmem:[%s5440_s19] sm:$0xff]  ;;  %s4694_s19 = smov 8  }
  0xf2   :  { %v4196_v10 = vpop.f32.mrb[0].mxu0 }
  0xf3   :  { %v162_v11 = vadd.f32 %v4196_v10, %v3950_v9  ;;  %v156_v12 = vpop.f32.mrb[1].mxu0 }
  0xf4   :  { %v157_v13 = vadd.f32 %v3950_v9, %v156_v12 }
  0xf5   :  { %v166_v14 = vmul.f32 5.656854, %v162_v11 }
  0xf6   :  { %v165_v16 = vmul.f32 5.656854, %v157_v13 }
  0xf7   :  { %v4836_v18 = vadd.f32 %v167_v15, %v166_v14 }
  0xf8   :  { %v4834_v17 = vadd.f32 %v167_v15, %v165_v16 }
  0xfa   :  { %4205 = vmatprep.mubr.msk.f32.mxu1 %vm181_vm1, %v4834_v17 }
  0xfb   :  { %4206 = vmatmul.mubr.msk.f32.vlgmr.msra.gmra.mrb[0].mxu1 %vm181_vm1, %v4836_v18 }
  0xfc   :  { %4230 = vmatprep.mubr.msk.f32.mxu1 %vm4690_vm2, %v4687_v21 }
 0x1ce   :  { %v4207_v20 = vpop.f32.mrb[0].mxu1 }
 0x1cf   :  { %v254_v22 = vpop.f32.mrb[1].mxu1  ;;  %v4857_v24 = vadd.f32 %v4207_v20, %v3953_v19 }
 0x1d0   :  { %v4847_v23 = vadd.f32 %v3953_v19, %v254_v22 }
 0x1d2   :  { %269 = vrot.lane.b32.xlu1 %v4847_v23, %s4688_s20  ;;  %265 = vrot.lane.b32.xlu0 %v4847_v23, %s4689_s15 }
 0x1d6   :  { %271 = vrot.lane.b32.xlu1 %v4857_v24, %s4688_s20  ;;  %267 = vrot.lane.b32.xlu0 %v4857_v24, %s4689_s15 }
 0x1da   :  { %275 = vrot.lane.b32.xlu1 %v4857_v24, %s4691_s28  ;;  %273 = vrot.lane.b32.xlu0 %v4847_v23, %s4691_s28 }
 0x1de   :  { %353 = vrot.lane.b32.xlu1 %v4857_v24, %s4692_s21  ;;  %277 = vrot.lane.b32.xlu0 %v4847_v23, %s4692_s21 }
 0x244   :  { %v4871_v25 = vpop.permute.xlu1 %269  ;;  %v4873_v26 = vpop.permute.xlu0 %265 }
 0x245   :  { %429 = vrot.lane.b32.xlu0 %v4873_v26, %s4692_s21 }
 0x248   :  { %v4877_v27 = vpop.permute.xlu1 %271  ;;  %v4879_v28 = vpop.permute.xlu0 %267 }
 0x249   :  { %581 = vrot.lane.b32.xlu0 %v4871_v25, %s4692_s21  ;;  %505 = vrot.lane.b32.xlu1 %v4879_v28, %s4692_s21 }
 0x24c   :  { %v4885_v29 = vpop.permute.xlu0 %273  ;;  %v4891_v30 = vpop.permute.xlu1 %275 }
 0x24d   :  { %657 = vrot.lane.b32.xlu1 %v4877_v27, %s4692_s21  ;;  %733 = vrot.lane.b32.xlu0 %v4885_v29, %s4692_s21 }
 0x250   :  { %v278_v31 = vpop.permute.xlu0 %277  ;;  %v354_v32 = vpop.permute.xlu1 %353 }
 0x251   :  { %809 = vrot.lane.b32.xlu1 %v4891_v30, %s4692_s21  ;;  %4209 = vmatpush3.xpose.msk.msra.mxu0 %vm83_vm0, %v278_v31 }
 0x252   :  { %4213 = vmatprep.subr.mxu0 %v4687_v21 }
 0x254   :  { %4211 = vmatmul.mubr.msk.f32.vlgmr.msra.gmra.mrb[2].mxu0 %vm83_vm0, %v4847_v23 }
 0x255   :  { %4214 = vmatpush3.xpose.msk.msra.mxu0 %vm83_vm0, %v354_v32  ;;  %4215 = vmatprep.mubr.msk.f32.mxu0 %vm4690_vm2, %v4687_v21 }
 0x256   :  { %4218 = vmatprep.subr.mxu0 %v4687_v21 }
 0x258   :  { %4216 = vmatmul.mubr.msk.f32.vlgmr.msra.gmra.mrb[4].mxu0 %vm83_vm0, %v4857_v24 }
 0x259   :  { %4220 = vmatprep.mubr.msk.f32.mxu0 %vm4690_vm2, %v4687_v21 }
 0x2b7   :  { %v430_v33 = vpop.permute.xlu0 %429 }
 0x2b8   :  { %4219 = vmatpush3.xpose.msk.msra.mxu0 %vm83_vm0, %v430_v33 }
 0x2b9   :  { %4223 = vmatprep.subr.mxu0 %v4687_v21 }
 0x2bb   :  { %v506_v34 = vpop.permute.xlu1 %505  ;;  %4221 = vmatmul.mubr.msk.f32.vlgmr.msra.gmra.mrb[6].mxu0 %vm83_vm0, %v4873_v26  ;;  %v582_v35 = vpop.permute.xlu0 %581 }
 0x2bc   :  { %4224 = vmatpush3.xpose.msk.msra.mxu0 %vm83_vm0, %v506_v34  ;;  %4229 = vmatpush3.xpose.msk.msra.mxu1 %vm83_vm0, %v582_v35 }
 0x2bd   :  { %4225 = vmatprep.mubr.msk.f32.mxu0 %vm4690_vm2, %v4687_v21  ;;  %4233 = vmatprep.subr.mxu0 %v4687_v21 }
 0x2be   :  { %4238 = vmatprep.subr.mxu1 %v4687_v21 }
 0x2bf   :  { %v658_v36 = vpop.permute.xlu1 %657  ;;  %4226 = vmatmul.mubr.msk.f32.vlgmr.msra.gmra.mrb[8].mxu0 %vm83_vm0, %v4879_v28  ;;  %4231 = vmatmul.mubr.msk.f32.vlgmr.msra.gmra.mrb[2].mxu1 %vm83_vm0, %v4871_v25  ;;  %v734_v37 = vpop.permute.xlu0 %733 }
 0x2c0   :  { %4234 = vmatpush3.xpose.msk.msra.mxu0 %vm83_vm0, %v658_v36  ;;  %4239 = vmatpush3.xpose.msk.msra.mxu1 %vm83_vm0, %v734_v37 }
 0x2c1   :  { %4235 = vmatprep.mubr.msk.f32.mxu0 %vm4690_vm2, %v4687_v21  ;;  %4240 = vmatprep.mubr.msk.f32.mxu1 %vm4690_vm2, %v4687_v21 }
 0x2c2   :  { %4243 = vmatprep.subr.mxu0 %v4687_v21  ;;  %4248 = vmatprep.subr.mxu1 %v4687_v21 }
 0x2c3   :  { %v810_v38 = vpop.permute.xlu1 %809  ;;  %4236 = vmatmul.mubr.msk.f32.vlgmr.msra.gmra.mrb[10].mxu0 %vm83_vm0, %v4877_v27  ;;  %4241 = vmatmul.mubr.msk.f32.vlgmr.msra.gmra.mrb[4].mxu1 %vm83_vm0, %v4885_v29 }
 0x2c4   :  { %4244 = vmatpush3.xpose.msk.msra.mxu0 %vm83_vm0, %v810_v38  ;;  %4245 = vmatprep.mubr.msk.f32.mxu0 %vm4690_vm2, %v4687_v21 }
 0x2c5   :  { %4253 = vmatprep.subr.mxu0 %v4687_v21  ;;  %4250 = vmatprep.mubr.msk.f32.mxu1 %vm4690_vm2, %v4687_v21 }
 0x2c7   :  { %4246 = vmatmul.mubr.msk.f32.vlgmr.msra.gmra.mrb[12].mxu0 %vm83_vm0, %v4891_v30 }
 0x2c8   :  { %4255 = vmatprep.mubr.msk.f32.mxu0 %vm4690_vm2, %v4687_v21 }
 0x327   :  { %v349_v39 = vpop.f32.mrb[2].mxu0 }
 0x328   :  { %v885_v40 = vmul.f32 0.35355338, %v349_v39  ;;  %v4212_v41 = vpop.f32.mrb[3].mxu0 }
 0x32a   :  { %v893_v42 = vsel %vm83_vm0, %v885_v40, -inf }
 0x32b   :  { %894 = vmax.xlane.f32.xlu0 %v893_v42  ;;  %v425_v43 = vpop.f32.mrb[4].mxu0 }
 0x32c   :  { %v886_v44 = vmul.f32 0.35355338, %v425_v43  ;;  %v4217_v45 = vpop.f32.mrb[5].mxu0 }
 0x32e   :  { %v896_v46 = vsel %vm83_vm0, %v886_v44, -inf }
 0x32f   :  { %897 = vmax.xlane.f32.xlu1 %v896_v46 }
 0x38e   :  { %v501_v47 = vpop.f32.mrb[6].mxu0 }
 0x38f   :  { %v887_v48 = vmul.f32 0.35355338, %v501_v47  ;;  %v4222_v49 = vpop.f32.mrb[7].mxu0 }
 0x391   :  { %v899_v50 = vsel %vm83_vm0, %v887_v48, -inf }
 0x392   :  { %900 = vmax.xlane.f32.xlu0 %v899_v50  ;;  %v577_v51 = vpop.f32.mrb[8].mxu0  ;;  %v653_v52 = vpop.f32.mrb[2].mxu1 }
 0x393   :  { %v888_v53 = vmul.f32 0.35355338, %v577_v51  ;;  %v889_v54 = vmul.f32 0.35355338, %v653_v52  ;;  %v4227_v55 = vpop.f32.mrb[9].mxu0  ;;  %v4232_v56 = vpop.f32.mrb[3].mxu1 }
 0x395   :  { %v902_v57 = vsel %vm83_vm0, %v888_v53, -inf  ;;  %v905_v58 = vsel %vm83_vm0, %v889_v54, -inf }
 0x396   :  { %903 = vmax.xlane.f32.xlu0 %v902_v57  ;;  %v729_v59 = vpop.f32.mrb[10].mxu0  ;;  %906 = vmax.xlane.f32.xlu1 %v905_v58  ;;  %v805_v60 = vpop.f32.mrb[4].mxu1 }
 0x397   :  { %v890_v61 = vmul.f32 0.35355338, %v729_v59  ;;  %v891_v62 = vmul.f32 0.35355338, %v805_v60  ;;  %v4237_v63 = vpop.f32.mrb[11].mxu0  ;;  %v4242_v0 = vpop.f32.mrb[5].mxu1 }
 0x399   :  { %v908_v1 = vsel %vm83_vm0, %v890_v61, -inf  ;;  %v911_v2 = vsel %vm83_vm0, %v891_v62, -inf }
 0x39a   :  { %909 = vmax.xlane.f32.xlu0 %v908_v1  ;;  %v881_v3 = vpop.f32.mrb[12].mxu0  ;;  %912 = vmax.xlane.f32.xlu1 %v911_v2 }
 0x39b   :  { %v892_v4 = vmul.f32 0.35355338, %v881_v3  ;;  %v4247_v5 = vpop.f32.mrb[13].mxu0 }
 0x39d   :  { %v914_v6 = vsel %vm83_vm0, %v892_v4, -inf }
 0x39e   :  { %915 = vmax.xlane.f32.xlu0 %v914_v6 }
 0x3ab   :  { %981 = vrot.lane.b32.xlu1 %v4847_v23, %s4693_s22 }
 0x3af   :  { %1133 = vrot.lane.b32.xlu1 %v4873_v26, %s4693_s22 }
 0x3b3   :  { %1209 = vrot.lane.b32.xlu1 %v4879_v28, %s4693_s22 }
 0x3b4   :  { %1057 = vrot.lane.b32.xlu0 %v4857_v24, %s4693_s22 }
 0x3b7   :  { %1361 = vrot.lane.b32.xlu1 %v4877_v27, %s4693_s22 }
 0x3b8   :  { %1285 = vrot.lane.b32.xlu0 %v4871_v25, %s4693_s22  ;;  %v895_v9 = vpop.xlane.xlu0 %894 }
 0x3b9   :  { %v917_v10 = vsub.f32 %v885_v40, %v895_v9 }
 0x3bb   :  { %v925_v12 = vmul.f32 1.442695, %v917_v10 }
 0x3bc   :  { %v898_v7 = vpop.xlane.xlu1 %897 }
 0x3bd   :  { %v918_v8 = vsub.f32 %v886_v44, %v898_v7 }
 0x3bf   :  { %v927_v11 = vmul.f32 1.442695, %v918_v8 }
 0x3c1   :  { %4572 = vpow2.f32 %v927_v11 }
 0x3c2   :  { %4574 = vpow2.f32 %v925_v12 }
 0x3cb   :  { %v4963_v13 = vpop.eup %4572 }
 0x3cc   :  { %v944_v14 = vsel %vm83_vm0, %v4963_v13, 0.0  ;;  %v4967_v15 = vpop.eup %4574 }
 0x3cd   :  { %v941_v16 = vsel %vm83_vm0, %v4967_v15, 0.0 }
 0x3d7   :  { %945 = vadd.xlane.f32.xlu0 %v944_v14 }
 0x3db   :  { %942 = vadd.xlane.f32.xlu1 %v941_v16 }
 0x41f   :  { %v901_v19 = vpop.xlane.xlu0 %900 }
 0x420   :  { %v919_v20 = vsub.f32 %v887_v48, %v901_v19 }
 0x422   :  { %v929_v22 = vmul.f32 1.442695, %v919_v20 }
 0x423   :  { %v907_v23 = vpop.xlane.xlu1 %906  ;;  %v904_v24 = vpop.xlane.xlu0 %903 }
 0x424   :  { %4576 = vpow2.f32 %v929_v22  ;;  %v921_v25 = vsub.f32 %v889_v54, %v907_v23  ;;  %v920_v26 = vsub.f32 %v888_v53, %v904_v24 }
 0x426   :  { %v933_v27 = vmul.f32 1.442695, %v921_v25  ;;  %v931_v28 = vmul.f32 1.442695, %v920_v26  ;;  %v1621_v25 = vld [vmem:[%s5421_s6] sm:$0xff]  ;;  %v1622_v26 = vld [vmem:[%s5421_s6 + $0x8] sm:$0xff] }
 0x427   :  { %v913_v31 = vpop.xlane.xlu1 %912  ;;  %v910_v32 = vpop.xlane.xlu0 %909 }
 0x428   :  { %4578 = vpow2.f32 %v933_v27  ;;  %v923_v33 = vsub.f32 %v891_v62, %v913_v31  ;;  %v922_v34 = vsub.f32 %v890_v61, %v910_v32  ;;  %v4480_v27 = vpack.c.bf16 %v1622_v26, %v1621_v25  ;;  %v1624_v31 = vld [vmem:[%s5421_s6 + $0x18] sm:$0xff]  ;;  %v3984_v26 = vld [vmem:[%s5428_s13] ss:$0 sm:$0xff] }
 0x429   :  { %4580 = vpow2.f32 %v931_v28  ;;  %v1623_v28 = vld [vmem:[%s5421_s6 + $0x10] sm:$0xff] }
 0x42a   :  { %v937_v35 = vmul.f32 1.442695, %v923_v33  ;;  %v935_v36 = vmul.f32 1.442695, %v922_v34  ;;  %v4484_v32 = vpack.c.bf16 %v1624_v31, %v1623_v28 }
 0x42b   :  { %v982_v37 = vpop.permute.xlu1 %981  ;;  %v916_v38 = vpop.xlane.xlu0 %915 }
 0x42c   :  { %4582 = vpow2.f32 %v937_v35  ;;  %v924_v39 = vsub.f32 %v892_v4, %v916_v38  ;;  %4249 = vmatpush3.msra.mxu1 %v982_v37 }
 0x42d   :  { %4584 = vpow2.f32 %v935_v36  ;;  %4258 = vmatprep.subr.mxu1 %v4687_v21 }
 0x42e   :  { %v4577_v40 = vpop.eup %4576  ;;  %v939_v41 = vmul.f32 1.442695, %v924_v39 }
 0x42f   :  { %v1058_v42 = vpop.permute.xlu0 %1057  ;;  %v947_v43 = vsel %vm83_vm0, %v4577_v40, 0.0  ;;  %v1134_v54 = vpop.permute.xlu1 %1133 }
 0x430   :  { %4586 = vpow2.f32 %v939_v41  ;;  %948 = vadd.xlane.f32.xlu1 %v947_v43  ;;  %4254 = vmatpush3.msra.mxu0 %v1058_v42 }
 0x431   :  { %4263 = vmatprep.subr.mxu0 %v4687_v21 }
 0x432   :  { %v4579_v44 = vpop.eup %4578 }
 0x433   :  { %v4581_v45 = vpop.eup %4580  ;;  %v953_v46 = vsel %vm83_vm0, %v4579_v44, 0.0  ;;  %v1210_v55 = vpop.permute.xlu1 %1209 }
 0x434   :  { %954 = vadd.xlane.f32.xlu1 %v953_v46  ;;  %v950_v47 = vsel %vm83_vm0, %v4581_v45, 0.0  ;;  %v1286_v56 = vpop.permute.xlu0 %1285 }
 0x435   :  { %951 = vadd.xlane.f32.xlu0 %v950_v47 }
 0x436   :  { %v4583_v48 = vpop.eup %4582 }
 0x437   :  { %v4585_v49 = vpop.eup %4584  ;;  %v959_v50 = vsel %vm83_vm0, %v4583_v48, 0.0  ;;  %v1362_v57 = vpop.permute.xlu1 %1361 }
 0x438   :  { %960 = vadd.xlane.f32.xlu1 %v959_v50  ;;  %v956_v51 = vsel %vm83_vm0, %v4585_v49, 0.0 }
 0x439   :  { %957 = vadd.xlane.f32.xlu0 %v956_v51 }
 0x43a   :  { %v4978_v52 = vpop.eup %4586 }
 0x43b   :  { %v962_v53 = vsel %vm83_vm0, %v4978_v52, 0.0 }
 0x43d   :  { %963 = vadd.xlane.f32.xlu0 %v962_v53 }
 0x449   :  { %1513 = vrot.lane.b32.xlu1 %v4891_v30, %s4693_s22 }
 0x453   :  { %1437 = vrot.lane.b32.xlu0 %v4885_v29, %s4693_s22 }
 0x464   :  { %v946_v58 = vpop.xlane.xlu0 %945 }
 0x465   :  { %4588 = vrcp.f32 %v946_v58 }
 0x468   :  { %v943_v59 = vpop.xlane.xlu1 %942 }
 0x469   :  { %4590 = vrcp.f32 %v943_v59 }
 0x46f   :  { %v4589_v60 = vpop.eup %4588 }
 0x470   :  { %v974_v61 = vmul.f32 %v4589_v60, %v4963_v13 }
 0x472   :  { %4256 = vmatmul.mubr.msk.f32.vlgmr.msra.gmra.mrb[14].mxu0 %vm83_vm0, %v974_v61 }
 0x473   :  { %v4591_v62 = vpop.eup %4590  ;;  %4264 = vmatpush3.msra.mxu0 %v1210_v55  ;;  %4265 = vmatprep.mubr.msk.f32.mxu0 %vm4690_vm2, %v4687_v21 }
 0x474   :  { %v973_v29 = vmul.f32 %v4591_v62, %v4967_v15  ;;  %4273 = vmatprep.subr.mxu0 %v4687_v21 }
 0x476   :  { %4251 = vmatmul.mubr.msk.f32.vlgmr.msra.gmra.mrb[6].mxu1 %vm83_vm0, %v973_v29 }
 0x477   :  { %4259 = vmatpush3.msra.mxu1 %v1134_v54  ;;  %4260 = vmatprep.mubr.msk.f32.mxu1 %vm4690_vm2, %v4687_v21 }
 0x478   :  { %4268 = vmatprep.subr.mxu1 %v4687_v21 }
 0x4bd   :  { %v949_v30 = vpop.xlane.xlu1 %948 }
 0x4be   :  { %4592 = vrcp.f32 %v949_v30 }
 0x4c1   :  { %v955_v63 = vpop.xlane.xlu1 %954 }
 0x4c2   :  { %4594 = vrcp.f32 %v955_v63  ;;  %v952_v0 = vpop.xlane.xlu0 %951 }
 0x4c3   :  { %4596 = vrcp.f32 %v952_v0 }
 0x4c5   :  { %v961_v1 = vpop.xlane.xlu1 %960 }
 0x4c6   :  { %4598 = vrcp.f32 %v961_v1  ;;  %v958_v2 = vpop.xlane.xlu0 %957 }
 0x4c7   :  { %4600 = vrcp.f32 %v958_v2 }
 0x4c8   :  { %v4593_v3 = vpop.eup %4592 }
 0x4c9   :  { %v975_v4 = vmul.f32 %v4593_v3, %v4577_v40  ;;  %v1514_v15 = vpop.permute.xlu1 %1513 }
 0x4ca   :  { %v964_v5 = vpop.xlane.xlu0 %963 }
 0x4cb   :  { %4602 = vrcp.f32 %v964_v5  ;;  %4261 = vmatmul.mubr.msk.f32.vlgmr.msra.gmra.mrb[8].mxu1 %vm83_vm0, %v975_v4 }
 0x4cc   :  { %v4595_v6 = vpop.eup %4594  ;;  %4269 = vmatpush3.msra.mxu1 %v1286_v56  ;;  %4270 = vmatprep.mubr.msk.f32.mxu1 %vm4690_vm2, %v4687_v21 }
 0x4cd   :  { %v4597_v7 = vpop.eup %4596  ;;  %v977_v8 = vmul.f32 %v4595_v6, %v4579_v44  ;;  %4278 = vmatprep.subr.mxu1 %v4687_v21 }
 0x4ce   :  { %v976_v9 = vmul.f32 %v4597_v7, %v4581_v45  ;;  %v1438_v10 = vpop.permute.xlu0 %1437 }
 0x4cf   :  { %4271 = vmatmul.mubr.msk.f32.vlgmr.msra.gmra.mrb[10].mxu1 %vm83_vm0, %v977_v8 }
 0x4d0   :  { %v4599_v11 = vpop.eup %4598  ;;  %4266 = vmatmul.mubr.msk.f32.vlgmr.msra.gmra.mrb[16].mxu0 %vm83_vm0, %v976_v9  ;;  %4279 = vmatpush3.msra.mxu1 %v1438_v10  ;;  %v1761_v9 = vld [vmem:[%s5423_s8 + $0x8] sm:$0xff] }
 0x4d1   :  { %v4601_v12 = vpop.eup %4600  ;;  %v979_v13 = vmul.f32 %v4599_v11, %v4583_v48  ;;  %4274 = vmatpush3.msra.mxu0 %v1362_v57  ;;  %4275 = vmatprep.mubr.msk.f32.mxu0 %vm4690_vm2, %v4687_v21  ;;  %v3980_v57 = vld [vmem:[%s5422_s7] ss:$0 sm:$0xff]  ;;  %v1762_v11 = vld [vmem:[%s5423_s8 + $0x10] sm:$0xff] }
 0x4d2   :  { %v978_v14 = vmul.f32 %v4601_v12, %v4585_v49  ;;  %4280 = vmatprep.mubr.msk.f32.mxu1 %vm4690_vm2, %v4687_v21  ;;  %4283 = vmatprep.subr.mxu0 %v4687_v21  ;;  %v1763_v12 = vld [vmem:[%s5423_s8 + $0x18] sm:$0xff] }
 0x4d3   :  { %4281 = vmatmul.mubr.msk.f32.vlgmr.msra.gmra.mrb[12].mxu1 %vm83_vm0, %v979_v13  ;;  %4481 = vmatprep.subr.bf16.mxu1 %v4480_v27  ;;  %v4492_v13 = vpack.c.bf16 %v1763_v12, %v1762_v11 }
 0x4d4   :  { %4276 = vmatmul.mubr.msk.f32.vlgmr.msra.gmra.mrb[18].mxu0 %vm83_vm0, %v978_v14  ;;  %4483 = vmatpush3.bf16.msra.mxu1 %v4480_v27 }
 0x4d5   :  { %v4603_v16 = vpop.eup %4602  ;;  %4284 = vmatpush3.msra.mxu0 %v1514_v15  ;;  %4285 = vmatprep.mubr.msk.f32.mxu0 %vm4690_vm2, %v4687_v21 }
 0x4d6   :  { %v980_v19 = vmul.f32 %v4603_v16, %v4978_v52  ;;  %4485 = vmatprep.subr.bf16.mxu1 %v4484_v32 }
 0x4d8   :  { %4286 = vmatmul.mubr.msk.f32.vlgmr.msra.gmra.mrb[20].mxu0 %vm83_vm0, %v980_v19  ;;  %4487 = vmatpush3.bf16.msra.mxu1 %v4484_v32 }
 0x545   :  { %v1129_v20 = vpop.f32.mrb[14].mxu0 }
 0x546   :  { %v4257_v22 = vpop.f32.mrb[15].mxu0 }
 0x549   :  { %v1053_v23 = vpop.f32.mrb[6].mxu1 }
 0x54a   :  { %v4252_v24 = vpop.f32.mrb[7].mxu1 }
 0x54b   :  { %v3983_v24 = vld [vmem:[%s5427_s12] ss:$0 sm:$0xff] }
 0x59e   :  { %v1205_v33 = vpop.f32.mrb[8].mxu1 }
 0x59f   :  { %v4262_v34 = vpop.f32.mrb[9].mxu1  ;;  %1591 = vrot.lane.b32.xlu0 %v1205_v33, %s4694_s19 }
 0x5a2   :  { %v1357_v35 = vpop.f32.mrb[10].mxu1 }
 0x5a3   :  { %v1281_v36 = vpop.f32.mrb[16].mxu0  ;;  %1599 = vrot.lane.b32.xlu0 %v1357_v35, %s4685_s2  ;;  %v4272_v37 = vpop.f32.mrb[11].mxu1  ;;  %v1862_v35 = vld [vmem:[%s5425_s10] sm:$0xff] }
 0x5a4   :  { %1593 = vrot.lane.b32.xlu1 %v1281_v36, %s4694_s19  ;;  %v4267_v38 = vpop.f32.mrb[17].mxu0  ;;  %v1863_v36 = vld [vmem:[%s5425_s10 + $0x8] sm:$0xff] }
 0x5a5   :  { %v4496_v37 = vpack.c.bf16 %v1863_v36, %v1862_v35  ;;  %v1864_v38 = vld [vmem:[%s5425_s10 + $0x10] sm:$0xff]  ;;  %v3992_v35 = vld [vmem:[#allocation2] ss:$0 sm:$0xff] }
 0x5a6   :  { %v1509_v39 = vpop.f32.mrb[12].mxu1 }
 0x5a7   :  { %v1433_v40 = vpop.f32.mrb[18].mxu0  ;;  %1607 = vrot.lane.b32.xlu0 %v1509_v39, %s4695_s3  ;;  %v4282_v41 = vpop.f32.mrb[13].mxu1  ;;  %4497 = vmatprep.subr.bf16.mxu1 %v4496_v37  ;;  %v1865_v39 = vld [vmem:[%s5425_s10 + $0x18] sm:$0xff] }
 0x5a8   :  { %1601 = vrot.lane.b32.xlu1 %v1433_v40, %s4685_s2  ;;  %v4277_v42 = vpop.f32.mrb[19].mxu0  ;;  %v4500_v40 = vpack.c.bf16 %v1865_v39, %v1864_v38  ;;  %v1866_v41 = vld [vmem:[%s5425_s10 + $0x20] sm:$0xff] }
 0x5a9   :  { %v1867_v42 = vld [vmem:[%s5425_s10 + $0x28] sm:$0xff] }
 0x5ab   :  { %v1585_v43 = vpop.f32.mrb[20].mxu0 }
 0x5ac   :  { %1609 = vrot.lane.b32.xlu1 %v1585_v43, %s4695_s3  ;;  %v4287_v44 = vpop.f32.mrb[21].mxu0  ;;  %v4504_v43 = vpack.c.bf16 %v1867_v42, %v1866_v41 }
 0x5ad   :  { %v1868_v44 = vld [vmem:[%s5425_s10 + $0x30] sm:$0xff] }
 0x611   :  { %v1592_v45 = vpop.permute.xlu0 %1591 }
 0x612   :  { %v1613_v48 = vsel %vm83_vm0, %v1053_v23, %v1592_v45  ;;  %v1869_v45 = vld [vmem:[%s5425_s10 + $0x38] sm:$0xff] }
 0x615   :  { %v1600_v46 = vpop.permute.xlu0 %1599 }
 0x616   :  { %v1594_v47 = vpop.permute.xlu1 %1593  ;;  %v1616_v49 = vsel %vm1615_vm3, %v1613_v48, %v1600_v46  ;;  %v4508_v46 = vpack.c.bf16 %v1869_v45, %v1868_v44 }
 0x617   :  { %v1614_v53 = vsel %vm83_vm0, %v1129_v20, %v1594_v47  ;;  %v3985_v47 = vld [vmem:[%s5424_s9] ss:$0 sm:$0xff] }
 0x619   :  { %v1608_v50 = vpop.permute.xlu0 %1607 }
 0x61a   :  { %v1602_v51 = vpop.permute.xlu1 %1601  ;;  %v1619_v52 = vsel %vm1618_vm4, %v1616_v49, %v1608_v50 }
 0x61b   :  { %4296 = vmatprep.mubr.msk.f32.mxu1 %vm181_vm1, %v1619_v52  ;;  %v1617_v54 = vsel %vm1615_vm3, %v1614_v53, %v1602_v51 }
 0x61e   :  { %v1610_v55 = vpop.permute.xlu1 %1609 }
 0x61f   :  { %v1620_v56 = vsel %vm1618_vm4, %v1617_v54, %v1610_v55 }
 0x620   :  { %4297 = vmatmul.mubr.msk.f32.vlgmr.msra.gmra.mrb[14].mxu1 %vm181_vm1, %v1620_v56 }
 0x621   :  { %4499 = vmatpush3.bf16.msra.mxu1 %v4496_v37 }
 0x622   :  { %4501 = vmatprep.subr.bf16.mxu1 %v4500_v40 }
 0x625   :  { %4503 = vmatpush3.bf16.msra.mxu1 %v4500_v40  ;;  %v3998_v40 = vld [vmem:[%s5420_s5 + $0x1] ss:$0 sm:$0xff] }
 0x626   :  { %4505 = vmatprep.subr.bf16.mxu1 %v4504_v43 }
 0x629   :  { %4507 = vmatpush3.bf16.msra.mxu1 %v4504_v43 }
 0x62a   :  { %4509 = vmatprep.subr.bf16.mxu1 %v4508_v46 }
 0x62d   :  { %4511 = vmatpush3.bf16.msra.mxu1 %v4508_v46 }
 0x62e   :  { %4350 = vmatprep.subr.mxu1 %v4687_v21 }
 0x6f3   :  { %v4298_v58 = vpop.f32.mrb[14].mxu1 }
 0x6f4   :  { %v1710_v59 = vadd.f32 %v4298_v58, %v3980_v57  ;;  %v1704_v60 = vpop.f32.mrb[15].mxu1 }
 0x6f5   :  { %v1705_v61 = vadd.f32 %v3980_v57, %v1704_v60 }
 0x6f6   :  { %v1714_v62 = vadd.f32 %v1710_v59, %v4836_v18 }
 0x6f7   :  { %v1713_v29 = vadd.f32 %v1705_v61, %v4834_v17  ;;  %v1760_v17 = vld [vmem:[%s5423_s8] sm:$0xff] }
 0x6f8   :  { %v1720_v30 = vsel %vm181_vm1, %v1714_v62, 0.0  ;;  %v4488_v10 = vpack.c.bf16 %v1761_v9, %v1760_v17 }
 0x6f9   :  { %1721 = vadd.xlane.f32.xlu1 %v1720_v30  ;;  %v1717_v63 = vsel %vm181_vm1, %v1713_v29, 0.0 }
 0x6fa   :  { %1718 = vadd.xlane.f32.xlu0 %v1717_v63  ;;  %4489 = vmatprep.subr.bf16.mxu0 %v4488_v10 }
 0x6fb   :  { %4491 = vmatpush3.bf16.msra.mxu0 %v4488_v10 }
 0x6fc   :  { %4493 = vmatprep.subr.bf16.mxu0 %v4492_v13 }
 0x6ff   :  { %4495 = vmatpush3.bf16.msra.mxu0 %v4492_v13  ;;  %v3993_v13 = vld [vmem:[%s5419_s4 + $0x20] sm:$0xff] }
 0x786   :  { %v1722_v0 = vpop.xlane.xlu1 %1721 }
 0x787   :  { %v1725_v1 = vmul.f32 0.03125, %v1722_v0  ;;  %v1719_v2 = vpop.xlane.xlu0 %1718 }
 0x788   :  { %v1724_v3 = vmul.f32 0.03125, %v1719_v2 }
 0x789   :  { %v1727_v4 = vsub.f32 %v1714_v62, %v1725_v1  ;;  %v3988_v62 = vld [vmem:[%s5426_s11] ss:$0 sm:$0xff] }
 0x78a   :  { %v1726_v5 = vsub.f32 %v1713_v29, %v1724_v3 }
 0x78b   :  { %v1729_v8 = vmul.f32 %v1727_v4, %v1727_v4 }
 0x78c   :  { %v1728_v6 = vmul.f32 %v1726_v5, %v1726_v5 }
 0x78d   :  { %v1733_v18 = vsel %vm181_vm1, %v1729_v8, 0.0 }
 0x78e   :  { %v1730_v7 = vsel %vm181_vm1, %v1728_v6, 0.0 }
 0x78f   :  { %1731 = vadd.xlane.f32.xlu0 %v1730_v7 }
 0x793   :  { %1734 = vadd.xlane.f32.xlu0 %v1733_v18 }
 0x81c   :  { %v1732_v14 = vpop.xlane.xlu0 %1731 }
 0x81d   :  { %v1736_v15 = vmul.f32 0.03125, %v1732_v14  ;;  %v3994_v14 = vld [vmem:[%s5419_s4 + $0x28] sm:$0xff] }
 0x81f   :  { %v1738_v16 = vadd.f32 1e-05, %v1736_v15  ;;  %v4512_v15 = vpack.c.bf16 %v3994_v14, %v3993_v13 }
 0x820   :  { %v1735_v19 = vpop.xlane.xlu0 %1734 }
 0x821   :  { %4604 = vrsqrt.f32 %v1738_v16  ;;  %v1737_v20 = vmul.f32 0.03125, %v1735_v19  ;;  %v3995_v16 = vld [vmem:[%s5419_s4 + $0x30] sm:$0xff]  ;;  %v3996_v19 = vld [vmem:[%s5419_s4 + $0x38] sm:$0xff]  ;;  %4513 = vmatprep.subr.bf16.mxu0 %v4512_v15 }
 0x823   :  { %v1739_v22 = vadd.f32 1e-05, %v1737_v20  ;;  %v4516_v20 = vpack.c.bf16 %v3996_v19, %v3995_v16 }
 0x825   :  { %4606 = vrsqrt.f32 %v1739_v22 }
 0x82b   :  { %v4605_v23 = vpop.eup %4604 }
 0x82c   :  { %v1742_v25 = vmul.f32 %v4605_v23, %v1726_v5 }
 0x82e   :  { %v1750_v27 = vmul.f32 %v3983_v24, %v1742_v25 }
 0x82f   :  { %v4607_v28 = vpop.eup %4606 }
 0x830   :  { %v1743_v31 = vmul.f32 %v4607_v28, %v1727_v4  ;;  %v1758_v32 = vadd.f32 %v3984_v26, %v1750_v27 }
 0x832   :  { %v1751_v33 = vmul.f32 %v3983_v24, %v1743_v31  ;;  %4307 = vmatprep.mubr.msk.f32.mxu0 %vm181_vm1, %v1758_v32  ;;  %v3991_v31 = vld [vmem:[%s5429_s14] ss:$0 sm:$0xff] }
 0x834   :  { %v1759_v34 = vadd.f32 %v3984_v26, %v1751_v33 }
 0x836   :  { %4308 = vmatmul.mubr.msk.f32.vlgmr.msra.gmra.mrb[22].mxu0 %vm181_vm1, %v1759_v34 }
 0x837   :  { %4515 = vmatpush3.bf16.msra.mxu0 %v4512_v15 }
 0x838   :  { %4517 = vmatprep.subr.bf16.mxu0 %v4516_v20 }
 0x83b   :  { %4519 = vmatpush3.bf16.msra.mxu0 %v4516_v20 }
 0x83c   :  { %4340 = vmatprep.subr.mxu0 %v4687_v21 }
 0x909   :  { %v4309_v48 = vpop.f32.mrb[22].mxu0 }
 0x90a   :  { %v1849_v49 = vadd.f32 %v4309_v48, %v3985_v47  ;;  %v1843_v50 = vpop.f32.mrb[23].mxu0 }
 0x90b   :  { %v1844_v51 = vadd.f32 %v3985_v47, %v1843_v50 }
 0x90c   :  { %v1855_v52 = vmul.f32 0.70710677, %v1849_v49  ;;  %v1853_v59 = vmul.f32 0.5, %v1849_v49 }
 0x90d   :  { %v1854_v53 = vmul.f32 0.70710677, %v1844_v51  ;;  %v1852_v57 = vmul.f32 0.5, %v1844_v51 }
 0x90e   :  { %4608 = verf.f32 %v1855_v52 }
 0x90f   :  { %4610 = verf.f32 %v1854_v53 }
 0x918   :  { %v4609_v54 = vpop.eup %4608 }
 0x919   :  { %v4611_v55 = vpop.eup %4610  ;;  %v1859_v56 = vadd.f32 1.0, %v4609_v54 }
 0x91a   :  { %v1858_v58 = vadd.f32 1.0, %v4611_v55 }
 0x91b   :  { %v1861_v61 = vmul.f32 %v1859_v56, %v1853_v59 }
 0x91c   :  { %v1860_v60 = vmul.f32 %v1858_v58, %v1852_v57 }
 0x91e   :  { %4326 = vmatprep.mubr.msk.f32.mxu1 %vm1877_vm5, %v1860_v60 }
 0x91f   :  { %4327 = vmatmul.mubr.msk.f32.vlgmr.msra.gmra.mrb[16].mxu1 %vm1877_vm5, %v1861_v61 }
 0x920   :  { %4352 = vmatprep.mubr.msk.f32.mxu1 %vm4690_vm2, %v4687_v21 }
 0x9f2   :  { %v4328_v29 = vpop.f32.mrb[16].mxu1 }
 0x9f3   :  { %v1956_v30 = vadd.f32 %v4328_v29, %v3988_v62  ;;  %v1950_v63 = vpop.f32.mrb[17].mxu1 }
 0x9f4   :  { %v1951_v0 = vadd.f32 %v3988_v62, %v1950_v63 }
 0x9f5   :  { %v1960_v1 = vadd.f32 %v1956_v30, %v1759_v34 }
 0x9f6   :  { %v1959_v2 = vadd.f32 %v1951_v0, %v1758_v32 }
 0x9f7   :  { %v1966_v3 = vsel %vm181_vm1, %v1960_v1, 0.0 }
 0x9f8   :  { %1967 = vadd.xlane.f32.xlu0 %v1966_v3  ;;  %v1963_v4 = vsel %vm181_vm1, %v1959_v2, 0.0 }
 0x9f9   :  { %1964 = vadd.xlane.f32.xlu1 %v1963_v4 }
 0xa85   :  { %v1968_v5 = vpop.xlane.xlu0 %1967 }
 0xa86   :  { %v1970_v6 = vmul.f32 0.03125, %v1968_v5  ;;  %v1965_v7 = vpop.xlane.xlu1 %1964 }
 0xa87   :  { %v1969_v8 = vmul.f32 0.03125, %v1965_v7 }
 0xa88   :  { %v1972_v18 = vsub.f32 %v1960_v1, %v1970_v6 }
 0xa89   :  { %v1971_v17 = vsub.f32 %v1959_v2, %v1969_v8 }
 0xa8a   :  { %v1974_v9 = vmul.f32 %v1972_v18, %v1972_v18 }
 0xa8b   :  { %v1973_v10 = vmul.f32 %v1971_v17, %v1971_v17 }
 0xa8c   :  { %v1978_v11 = vsel %vm181_vm1, %v1974_v9, 0.0 }
 0xa8d   :  { %1979 = vadd.xlane.f32.xlu0 %v1978_v11  ;;  %v1975_v12 = vsel %vm181_vm1, %v1973_v10, 0.0 }
 0xa8e   :  { %1976 = vadd.xlane.f32.xlu1 %v1975_v12 }
 0xb1a   :  { %v1980_v22 = vpop.xlane.xlu0 %1979 }
 0xb1b   :  { %v1982_v23 = vmul.f32 0.03125, %v1980_v22  ;;  %v1977_v24 = vpop.xlane.xlu1 %1976 }
 0xb1c   :  { %v1981_v25 = vmul.f32 0.03125, %v1977_v24 }
 0xb1d   :  { %v1984_v26 = vadd.f32 1e-05, %v1982_v23 }
 0xb1e   :  { %v1983_v27 = vadd.f32 1e-05, %v1981_v25 }
 0xb1f   :  { %4612 = vrsqrt.f32 %v1984_v26 }
 0xb20   :  { %4614 = vrsqrt.f32 %v1983_v27 }
 0xb29   :  { %v4613_v28 = vpop.eup %4612 }
 0xb2a   :  { %v4615_v32 = vpop.eup %4614  ;;  %v1988_v33 = vmul.f32 %v4613_v28, %v1972_v18 }
 0xb2b   :  { %v1987_v34 = vmul.f32 %v4615_v32, %v1971_v17 }
 0xb2c   :  { %v1996_v36 = vmul.f32 %v3991_v31, %v1988_v33 }
 0xb2d   :  { %v1995_v37 = vmul.f32 %v3991_v31, %v1987_v34 }
 0xb2e   :  { %v5125_v39 = vadd.f32 %v3992_v35, %v1996_v36 }
 0xb2f   :  { %v5123_v38 = vadd.f32 %v3992_v35, %v1995_v37 }
 0xb31   :  { %4337 = vmatprep.mubr.msk.f32.mxu0 %vm181_vm1, %v5123_v38 }
 0xb32   :  { %4338 = vmatmul.mubr.msk.f32.vlgmr.msra.gmra.mrb[24].mxu0 %vm181_vm1, %v5125_v39 }
 0xb33   :  { %4342 = vmatprep.mubr.msk.f32.mxu0 %vm4690_vm2, %v4687_v21 }
 0xc05   :  { %v4339_v41 = vpop.f32.mrb[24].mxu0 }
 0xc06   :  { %v5136_v42 = vadd.f32 %v4339_v41, %v3998_v40  ;;  %v2090_v43 = vpop.f32.mrb[25].mxu0 }
 0xc07   :  { %v5138_v44 = vadd.f32 %v3998_v40, %v2090_v43 }
 0xc08   :  { %2103 = vrot.lane.b32.xlu0 %v5136_v42, %s4689_s15 }
 0xc09   :  { %2101 = vrot.lane.b32.xlu1 %v5138_v44, %s4689_s15 }
 0xc0c   :  { %2109 = vrot.lane.b32.xlu0 %v5138_v44, %s4691_s28 }
 0xc0d   :  { %2105 = vrot.lane.b32.xlu1 %v5138_v44, %s4688_s20 }
 0xc10   :  { %2113 = vrot.lane.b32.xlu0 %v5138_v44, %s4692_s21 }
 0xc11   :  { %2107 = vrot.lane.b32.xlu1 %v5136_v42, %s4688_s20 }
 0xc15   :  { %2111 = vrot.lane.b32.xlu1 %v5136_v42, %s4691_s28 }
 0xc19   :  { %2189 = vrot.lane.b32.xlu1 %v5136_v42, %s4692_s21 }
 0xc7a   :  { %v5156_v45 = vpop.permute.xlu0 %2103 }
 0xc7b   :  { %2341 = vrot.lane.b32.xlu1 %v5156_v45, %s4692_s21  ;;  %v5160_v46 = vpop.permute.xlu1 %2101 }
 0xc7c   :  { %2265 = vrot.lane.b32.xlu0 %v5160_v46, %s4692_s21 }
 0xc7e   :  { %v5164_v47 = vpop.permute.xlu0 %2109 }
 0xc7f   :  { %v5166_v48 = vpop.permute.xlu1 %2105 }
 0xc80   :  { %2417 = vrot.lane.b32.xlu0 %v5166_v48, %s4692_s21 }
 0xc82   :  { %v2114_v49 = vpop.permute.xlu0 %2113 }
 0xc83   :  { %4341 = vmatpush3.xpose.msk.msra.mxu0 %vm83_vm0, %v2114_v49  ;;  %v5171_v50 = vpop.permute.xlu1 %2107 }
 0xc84   :  { %2569 = vrot.lane.b32.xlu0 %v5164_v47, %s4692_s21  ;;  %2493 = vrot.lane.b32.xlu1 %v5171_v50, %s4692_s21 }
 0xc85   :  { %4345 = vmatprep.subr.mxu0 %v4687_v21 }
 0xc86   :  { %4343 = vmatmul.mubr.msk.f32.vlgmr.msra.gmra.mrb[26].mxu0 %vm83_vm0, %v5138_v44 }
 0xc87   :  { %v5180_v51 = vpop.permute.xlu1 %2111  ;;  %4347 = vmatprep.mubr.msk.f32.mxu0 %vm4690_vm2, %v4687_v21 }
 0xc88   :  { %2645 = vrot.lane.b32.xlu1 %v5180_v51, %s4692_s21 }
 0xc8b   :  { %v2190_v52 = vpop.permute.xlu1 %2189 }
 0xc8c   :  { %4346 = vmatpush3.xpose.msk.msra.mxu0 %vm83_vm0, %v2190_v52 }
 0xc8d   :  { %4355 = vmatprep.subr.mxu0 %v4687_v21 }
 0xc8f   :  { %4348 = vmatmul.mubr.msk.f32.vlgmr.msra.gmra.mrb[28].mxu0 %vm83_vm0, %v5136_v42 }
 0xc90   :  { %4357 = vmatprep.mubr.msk.f32.mxu0 %vm4690_vm2, %v4687_v21 }
 0xced   :  { %v2342_v53 = vpop.permute.xlu1 %2341 }
 0xcee   :  { %v2266_v54 = vpop.permute.xlu0 %2265  ;;  %4356 = vmatpush3.xpose.msk.msra.mxu0 %vm83_vm0, %v2342_v53 }
 0xcef   :  { %4351 = vmatpush3.xpose.msk.msra.mxu1 %vm83_vm0, %v2266_v54  ;;  %4365 = vmatprep.subr.mxu0 %v4687_v21 }
 0xcf0   :  { %4360 = vmatprep.subr.mxu1 %v4687_v21 }
 0xcf1   :  { %4358 = vmatmul.mubr.msk.f32.vlgmr.msra.gmra.mrb[30].mxu0 %vm83_vm0, %v5156_v45 }
 0xcf2   :  { %4353 = vmatmul.mubr.msk.f32.vlgmr.msra.gmra.mrb[18].mxu1 %vm83_vm0, %v5160_v46  ;;  %v2418_v55 = vpop.permute.xlu0 %2417  ;;  %4367 = vmatprep.mubr.msk.f32.mxu0 %vm4690_vm2, %v4687_v21 }
 0xcf3   :  { %4361 = vmatpush3.xpose.msk.msra.mxu1 %vm83_vm0, %v2418_v55  ;;  %4362 = vmatprep.mubr.msk.f32.mxu1 %vm4690_vm2, %v4687_v21 }
 0xcf4   :  { %4370 = vmatprep.subr.mxu1 %v4687_v21 }
 0xcf6   :  { %4363 = vmatmul.mubr.msk.f32.vlgmr.msra.gmra.mrb[20].mxu1 %vm83_vm0, %v5166_v48  ;;  %v2570_v56 = vpop.permute.xlu0 %2569  ;;  %v2494_v57 = vpop.permute.xlu1 %2493 }
 0xcf7   :  { %4366 = vmatpush3.xpose.msk.msra.mxu0 %vm83_vm0, %v2494_v57  ;;  %4371 = vmatpush3.xpose.msk.msra.mxu1 %vm83_vm0, %v2570_v56 }
 0xcf8   :  { %4372 = vmatprep.mubr.msk.f32.mxu1 %vm4690_vm2, %v4687_v21  ;;  %4375 = vmatprep.subr.mxu0 %v4687_v21 }
 0xcf9   :  { %4380 = vmatprep.subr.mxu1 %v4687_v21 }
 0xcfa   :  { %4368 = vmatmul.mubr.msk.f32.vlgmr.msra.gmra.mrb[32].mxu0 %vm83_vm0, %v5171_v50  ;;  %4373 = vmatmul.mubr.msk.f32.vlgmr.msra.gmra.mrb[22].mxu1 %vm83_vm0, %v5164_v47  ;;  %v2646_v58 = vpop.permute.xlu1 %2645 }
 0xcfb   :  { %4376 = vmatpush3.xpose.msk.msra.mxu0 %vm83_vm0, %v2646_v58  ;;  %4377 = vmatprep.mubr.msk.f32.mxu0 %vm4690_vm2, %v4687_v21 }
 0xcfc   :  { %4385 = vmatprep.subr.mxu0 %v4687_v21  ;;  %4382 = vmatprep.mubr.msk.f32.mxu1 %vm4690_vm2, %v4687_v21 }
 0xcfe   :  { %4378 = vmatmul.mubr.msk.f32.vlgmr.msra.gmra.mrb[34].mxu0 %vm83_vm0, %v5180_v51 }
 0xcff   :  { %4387 = vmatprep.mubr.msk.f32.mxu0 %vm4690_vm2, %v4687_v21 }
 0xd59   :  { %v2185_v59 = vpop.f32.mrb[26].mxu0 }
 0xd5a   :  { %v2721_v60 = vmul.f32 0.35355338, %v2185_v59  ;;  %v4344_v61 = vpop.f32.mrb[27].mxu0 }
 0xd5c   :  { %v2729_v62 = vsel %vm83_vm0, %v2721_v60, -inf }
 0xd5d   :  { %2730 = vmax.xlane.f32.xlu0 %v2729_v62 }
 0xd62   :  { %v2261_v29 = vpop.f32.mrb[28].mxu0 }
 0xd63   :  { %v2722_v30 = vmul.f32 0.35355338, %v2261_v29  ;;  %v4349_v63 = vpop.f32.mrb[29].mxu0 }
 0xd65   :  { %v2732_v0 = vsel %vm83_vm0, %v2722_v30, -inf }
 0xd66   :  { %2733 = vmax.xlane.f32.xlu1 %v2732_v0 }
 0xdc4   :  { %v2413_v1 = vpop.f32.mrb[30].mxu0 }
 0xdc5   :  { %v2337_v2 = vpop.f32.mrb[18].mxu1  ;;  %v4359_v3 = vpop.f32.mrb[31].mxu0  ;;  %v2724_v6 = vmul.f32 0.35355338, %v2413_v1 }
 0xdc6   :  { %v2723_v4 = vmul.f32 0.35355338, %v2337_v2  ;;  %v4354_v5 = vpop.f32.mrb[19].mxu1 }
 0xdc7   :  { %v2738_v10 = vsel %vm83_vm0, %v2724_v6, -inf }
 0xdc8   :  { %v2735_v7 = vsel %vm83_vm0, %v2723_v4, -inf }
 0xdc9   :  { %2736 = vmax.xlane.f32.xlu0 %v2735_v7  ;;  %v2489_v8 = vpop.f32.mrb[20].mxu1 }
 0xdca   :  { %v2725_v18 = vmul.f32 0.35355338, %v2489_v8  ;;  %v4364_v17 = vpop.f32.mrb[21].mxu1 }
 0xdcc   :  { %v2741_v9 = vsel %vm83_vm0, %v2725_v18, -inf }
 0xdcd   :  { %v2641_v11 = vpop.f32.mrb[22].mxu1  ;;  %2742 = vmax.xlane.f32.xlu1 %v2741_v9  ;;  %2739 = vmax.xlane.f32.xlu0 %v2738_v10  ;;  %v2565_v12 = vpop.f32.mrb[32].mxu0 }
 0xdce   :  { %v2727_v13 = vmul.f32 0.35355338, %v2641_v11  ;;  %v2726_v14 = vmul.f32 0.35355338, %v2565_v12  ;;  %v4369_v15 = vpop.f32.mrb[33].mxu0  ;;  %v4374_v16 = vpop.f32.mrb[23].mxu1 }
 0xdd0   :  { %v2747_v19 = vsel %vm83_vm0, %v2727_v13, -inf  ;;  %v2744_v20 = vsel %vm83_vm0, %v2726_v14, -inf }
 0xdd1   :  { %2748 = vmax.xlane.f32.xlu1 %v2747_v19  ;;  %2745 = vmax.xlane.f32.xlu0 %v2744_v20  ;;  %v2717_v22 = vpop.f32.mrb[34].mxu0 }
 0xdd2   :  { %v2728_v23 = vmul.f32 0.35355338, %v2717_v22  ;;  %v4379_v24 = vpop.f32.mrb[35].mxu0 }
 0xdd4   :  { %v2750_v25 = vsel %vm83_vm0, %v2728_v23, -inf }
 0xdd5   :  { %2751 = vmax.xlane.f32.xlu0 %v2750_v25 }
 0xde2   :  { %2817 = vrot.lane.b32.xlu1 %v5138_v44, %s4693_s22 }
 0xde6   :  { %2969 = vrot.lane.b32.xlu1 %v5160_v46, %s4693_s22 }
 0xdea   :  { %3045 = vrot.lane.b32.xlu1 %v5156_v45, %s4693_s22  ;;  %v2731_v28 = vpop.xlane.xlu0 %2730 }
 0xdeb   :  { %2893 = vrot.lane.b32.xlu0 %v5136_v42, %s4693_s22  ;;  %v2753_v31 = vsub.f32 %v2721_v60, %v2731_v28 }
 0xded   :  { %v2761_v33 = vmul.f32 1.442695, %v2753_v31 }
 0xdee   :  { %3197 = vrot.lane.b32.xlu1 %v5171_v50, %s4693_s22 }
 0xdef   :  { %3121 = vrot.lane.b32.xlu0 %v5166_v48, %s4693_s22 }
 0xdf3   :  { %v2734_v26 = vpop.xlane.xlu1 %2733 }
 0xdf4   :  { %v2754_v27 = vsub.f32 %v2722_v30, %v2734_v26 }
 0xdf6   :  { %v2763_v32 = vmul.f32 1.442695, %v2754_v27 }
 0xdf8   :  { %4616 = vpow2.f32 %v2763_v32 }
 0xdf9   :  { %4618 = vpow2.f32 %v2761_v33 }
 0xe02   :  { %v5248_v34 = vpop.eup %4616 }
 0xe03   :  { %v2780_v35 = vsel %vm83_vm0, %v5248_v34, 0.0  ;;  %v5252_v36 = vpop.eup %4618 }
 0xe04   :  { %v2777_v37 = vsel %vm83_vm0, %v5252_v36, 0.0 }
 0xe0e   :  { %2781 = vadd.xlane.f32.xlu0 %v2780_v35 }
 0xe12   :  { %2778 = vadd.xlane.f32.xlu1 %v2777_v37 }
 0xe56   :  { %v2737_v40 = vpop.xlane.xlu0 %2736 }
 0xe57   :  { %v2755_v41 = vsub.f32 %v2723_v4, %v2737_v40 }
 0xe59   :  { %v2765_v42 = vmul.f32 1.442695, %v2755_v41 }
 0xe5a   :  { %v2740_v43 = vpop.xlane.xlu0 %2739  ;;  %v2743_v44 = vpop.xlane.xlu1 %2742 }
 0xe5b   :  { %4620 = vpow2.f32 %v2765_v42  ;;  %v2756_v45 = vsub.f32 %v2724_v6, %v2740_v43  ;;  %v2757_v46 = vsub.f32 %v2725_v18, %v2743_v44 }
 0xe5d   :  { %v2767_v48 = vmul.f32 1.442695, %v2756_v45  ;;  %v2769_v49 = vmul.f32 1.442695, %v2757_v46  ;;  %v4025_v45 = vld [vmem:[%s5421_s6 + $0x20] sm:$0xff]  ;;  %v4026_v46 = vld [vmem:[%s5421_s6 + $0x28] sm:$0xff] }
 0xe5e   :  { %v2746_v50 = vpop.xlane.xlu0 %2745  ;;  %v2749_v52 = vpop.xlane.xlu1 %2748 }
 0xe5f   :  { %4622 = vpow2.f32 %v2767_v48  ;;  %v2758_v53 = vsub.f32 %v2726_v14, %v2746_v50  ;;  %v2759_v54 = vsub.f32 %v2727_v13, %v2749_v52  ;;  %v4520_v48 = vpack.c.bf16 %v4026_v46, %v4025_v45  ;;  %v4036_v45 = vld [vmem:[%s5428_s13 + $0x1] ss:$0 sm:$0xff] }
 0xe60   :  { %4624 = vpow2.f32 %v2769_v49  ;;  %v4028_v49 = vld [vmem:[%s5421_s6 + $0x38] sm:$0xff] }
 0xe61   :  { %v2771_v55 = vmul.f32 1.442695, %v2758_v53  ;;  %v2773_v56 = vmul.f32 1.442695, %v2759_v54 }
 0xe62   :  { %v2752_v57 = vpop.xlane.xlu0 %2751  ;;  %v2818_v58 = vpop.permute.xlu1 %2817 }
 0xe63   :  { %4626 = vpow2.f32 %v2771_v55  ;;  %v2760_v59 = vsub.f32 %v2728_v23, %v2752_v57  ;;  %4381 = vmatpush3.msra.mxu1 %v2818_v58 }
 0xe64   :  { %4628 = vpow2.f32 %v2773_v56  ;;  %4390 = vmatprep.subr.mxu1 %v4687_v21 }
 0xe65   :  { %v4621_v60 = vpop.eup %4620  ;;  %v2775_v61 = vmul.f32 1.442695, %v2760_v59 }
 0xe66   :  { %v2894_v62 = vpop.permute.xlu0 %2893  ;;  %v2783_v29 = vsel %vm83_vm0, %v4621_v60, 0.0  ;;  %v2970_v8 = vpop.permute.xlu1 %2969 }
 0xe67   :  { %4630 = vpow2.f32 %v2775_v61  ;;  %2784 = vadd.xlane.f32.xlu1 %v2783_v29  ;;  %4386 = vmatpush3.msra.mxu0 %v2894_v62 }
 0xe68   :  { %4395 = vmatprep.subr.mxu0 %v4687_v21 }
 0xe69   :  { %v4623_v30 = vpop.eup %4622 }
 0xe6a   :  { %v4625_v63 = vpop.eup %4624  ;;  %v2786_v0 = vsel %vm83_vm0, %v4623_v30, 0.0  ;;  %v3046_v18 = vpop.permute.xlu1 %3045 }
 0xe6b   :  { %2787 = vadd.xlane.f32.xlu0 %v2786_v0  ;;  %v2789_v1 = vsel %vm83_vm0, %v4625_v63, 0.0  ;;  %v3122_v17 = vpop.permute.xlu0 %3121 }
 0xe6c   :  { %2790 = vadd.xlane.f32.xlu1 %v2789_v1 }
 0xe6d   :  { %v4627_v2 = vpop.eup %4626 }
 0xe6e   :  { %v4629_v3 = vpop.eup %4628  ;;  %v2792_v4 = vsel %vm83_vm0, %v4627_v2, 0.0  ;;  %v3198_v9 = vpop.permute.xlu1 %3197 }
 0xe6f   :  { %2793 = vadd.xlane.f32.xlu0 %v2792_v4  ;;  %v2795_v5 = vsel %vm83_vm0, %v4629_v3, 0.0 }
 0xe70   :  { %2796 = vadd.xlane.f32.xlu1 %v2795_v5 }
 0xe71   :  { %v5263_v6 = vpop.eup %4630 }
 0xe72   :  { %v2798_v7 = vsel %vm83_vm0, %v5263_v6, 0.0 }
 0xe73   :  { %2799 = vadd.xlane.f32.xlu0 %v2798_v7 }
 0xe81   :  { %3349 = vrot.lane.b32.xlu1 %v5180_v51, %s4693_s22 }
 0xe89   :  { %3273 = vrot.lane.b32.xlu0 %v5164_v47, %s4693_s22 }
 0xe9b   :  { %v2782_v10 = vpop.xlane.xlu0 %2781 }
 0xe9c   :  { %4632 = vrcp.f32 %v2782_v10 }
 0xe9f   :  { %v2779_v11 = vpop.xlane.xlu1 %2778 }
 0xea0   :  { %4634 = vrcp.f32 %v2779_v11 }
 0xea6   :  { %v4633_v12 = vpop.eup %4632 }
 0xea7   :  { %v2810_v13 = vmul.f32 %v4633_v12, %v5248_v34 }
 0xea9   :  { %4388 = vmatmul.mubr.msk.f32.vlgmr.msra.gmra.mrb[36].mxu0 %vm83_vm0, %v2810_v13 }
 0xeaa   :  { %v4635_v14 = vpop.eup %4634  ;;  %4396 = vmatpush3.msra.mxu0 %v3046_v18  ;;  %4397 = vmatprep.mubr.msk.f32.mxu0 %vm4690_vm2, %v4687_v21 }
 0xeab   :  { %v2809_v47 = vmul.f32 %v4635_v14, %v5252_v36  ;;  %4405 = vmatprep.subr.mxu0 %v4687_v21 }
 0xead   :  { %4383 = vmatmul.mubr.msk.f32.vlgmr.msra.gmra.mrb[24].mxu1 %vm83_vm0, %v2809_v47 }
 0xeae   :  { %4391 = vmatpush3.msra.mxu1 %v2970_v8  ;;  %4392 = vmatprep.mubr.msk.f32.mxu1 %vm4690_vm2, %v4687_v21 }
 0xeaf   :  { %4400 = vmatprep.subr.mxu1 %v4687_v21 }
 0xef4   :  { %v2785_v51 = vpop.xlane.xlu1 %2784 }
 0xef5   :  { %4636 = vrcp.f32 %v2785_v51 }
 0xef8   :  { %v2788_v15 = vpop.xlane.xlu0 %2787 }
 0xef9   :  { %4638 = vrcp.f32 %v2788_v15  ;;  %v2791_v16 = vpop.xlane.xlu1 %2790 }
 0xefa   :  { %4640 = vrcp.f32 %v2791_v16 }
 0xefc   :  { %v2794_v19 = vpop.xlane.xlu0 %2793 }
 0xefd   :  { %4642 = vrcp.f32 %v2794_v19  ;;  %v2797_v20 = vpop.xlane.xlu1 %2796 }
 0xefe   :  { %4644 = vrcp.f32 %v2797_v20 }
 0xeff   :  { %v4637_v22 = vpop.eup %4636 }
 0xf00   :  { %v2811_v23 = vmul.f32 %v4637_v22, %v4621_v60  ;;  %v2800_v24 = vpop.xlane.xlu0 %2799 }
 0xf01   :  { %4646 = vrcp.f32 %v2800_v24  ;;  %v3350_v36 = vpop.permute.xlu1 %3349 }
 0xf02   :  { %4393 = vmatmul.mubr.msk.f32.vlgmr.msra.gmra.mrb[26].mxu1 %vm83_vm0, %v2811_v23 }
 0xf03   :  { %v4639_v25 = vpop.eup %4638  ;;  %4401 = vmatpush3.msra.mxu1 %v3122_v17  ;;  %4402 = vmatprep.mubr.msk.f32.mxu1 %vm4690_vm2, %v4687_v21  ;;  %v4030_v17 = vld [vmem:[%s5422_s7 + $0x1] ss:$0 sm:$0xff] }
 0xf04   :  { %v4641_v26 = vpop.eup %4640  ;;  %v2812_v27 = vmul.f32 %v4639_v25, %v4623_v30  ;;  %4410 = vmatprep.subr.mxu1 %v4687_v21  ;;  %v3274_v31 = vpop.permute.xlu0 %3273 }
 0xf05   :  { %v2813_v28 = vmul.f32 %v4641_v26, %v4625_v63 }
 0xf06   :  { %4398 = vmatmul.mubr.msk.f32.vlgmr.msra.gmra.mrb[38].mxu0 %vm83_vm0, %v2812_v27  ;;  %v4038_v27 = vld [vmem:[%s5423_s8 + $0x28] sm:$0xff] }
 0xf07   :  { %v4643_v32 = vpop.eup %4642  ;;  %4403 = vmatmul.mubr.msk.f32.vlgmr.msra.gmra.mrb[28].mxu1 %vm83_vm0, %v2813_v28  ;;  %4406 = vmatpush3.msra.mxu0 %v3198_v9 }
 0xf08   :  { %v4645_v33 = vpop.eup %4644  ;;  %v2814_v34 = vmul.f32 %v4643_v32, %v4627_v2  ;;  %4411 = vmatpush3.msra.mxu1 %v3274_v31  ;;  %4407 = vmatprep.mubr.msk.f32.mxu0 %vm4690_vm2, %v4687_v21  ;;  %v4039_v31 = vld [vmem:[%s5423_s8 + $0x30] sm:$0xff]  ;;  %v4040_v32 = vld [vmem:[%s5423_s8 + $0x38] sm:$0xff] }
 0xf09   :  { %v2815_v35 = vmul.f32 %v4645_v33, %v4629_v3  ;;  %4412 = vmatprep.mubr.msk.f32.mxu1 %vm4690_vm2, %v4687_v21  ;;  %4415 = vmatprep.subr.mxu0 %v4687_v21  ;;  %v4532_v33 = vpack.c.bf16 %v4040_v32, %v4039_v31  ;;  %v3851_v32 = vld [vmem:[%s5431_s16] sm:$0xff] }
 0xf0a   :  { %4408 = vmatmul.mubr.msk.f32.vlgmr.msra.gmra.mrb[40].mxu0 %vm83_vm0, %v2814_v34  ;;  %4521 = vmatprep.subr.bf16.mxu1 %v4520_v48 }
 0xf0b   :  { %v4647_v37 = vpop.eup %4646  ;;  %4413 = vmatmul.mubr.msk.f32.vlgmr.msra.gmra.mrb[30].mxu1 %vm83_vm0, %v2815_v35  ;;  %4416 = vmatpush3.msra.mxu0 %v3350_v36 }
 0xf0c   :  { %v2816_v40 = vmul.f32 %v4647_v37, %v5263_v6  ;;  %4417 = vmatprep.mubr.msk.f32.mxu0 %vm4690_vm2, %v4687_v21  ;;  %4523 = vmatpush3.bf16.msra.mxu1 %v4520_v48  ;;  %v4027_v21 = vld [vmem:[%s5421_s6 + $0x30] sm:$0xff] }
 0xf0d   :  { %v4524_v50 = vpack.c.bf16 %v4028_v49, %v4027_v21 }
 0xf0e   :  { %4418 = vmatmul.mubr.msk.f32.vlgmr.msra.gmra.mrb[42].mxu0 %vm83_vm0, %v2816_v40 }
 0xf0f   :  { %4525 = vmatprep.subr.bf16.mxu1 %v4524_v50 }
 0xf10   :  { %4527 = vmatpush3.bf16.msra.mxu1 %v4524_v50 }
 0xf7c   :  { %v2965_v41 = vpop.f32.mrb[36].mxu0 }
 0xf7d   :  { %v4389_v42 = vpop.f32.mrb[37].mxu0 }
 0xf80   :  { %v2889_v43 = vpop.f32.mrb[24].mxu1 }
 0xf81   :  { %v4384_v44 = vpop.f32.mrb[25].mxu1 }
 0xfd5   :  { %v3041_v52 = vpop.f32.mrb[26].mxu1 }
 0xfd6   :  { %3427 = vrot.lane.b32.xlu0 %v3041_v52, %s4694_s19  ;;  %v4394_v53 = vpop.f32.mrb[27].mxu1 }
 0xfd7   :  { %v4045_v53 = vld [vmem:[%s5425_s10 + $0x40] sm:$0xff] }
 0xfd9   :  { %v3117_v54 = vpop.f32.mrb[38].mxu0 }
 0xfda   :  { %v3193_v55 = vpop.f32.mrb[28].mxu1  ;;  %3429 = vrot.lane.b32.xlu1 %v3117_v54, %s4694_s19  ;;  %v4399_v56 = vpop.f32.mrb[39].mxu0  ;;  %v4046_v54 = vld [vmem:[%s5425_s10 + $0x48] sm:$0xff] }
 0xfdb   :  { %3435 = vrot.lane.b32.xlu0 %v3193_v55, %s4685_s2  ;;  %v4404_v57 = vpop.f32.mrb[29].mxu1  ;;  %v4536_v55 = vpack.c.bf16 %v4046_v54, %v4045_v53  ;;  %v4047_v56 = vld [vmem:[%s5425_s10 + $0x50] sm:$0xff] }
 0xfdc   :  { %v4048_v57 = vld [vmem:[%s5425_s10 + $0x58] sm:$0xff] }
 0xfdd   :  { %v3269_v58 = vpop.f32.mrb[40].mxu0  ;;  %4537 = vmatprep.subr.bf16.mxu1 %v4536_v55 }
 0xfde   :  { %v3345_v59 = vpop.f32.mrb[30].mxu1  ;;  %3437 = vrot.lane.b32.xlu1 %v3269_v58, %s4685_s2  ;;  %v4409_v60 = vpop.f32.mrb[41].mxu0  ;;  %v4540_v58 = vpack.c.bf16 %v4048_v57, %v4047_v56 }
 0xfdf   :  { %3443 = vrot.lane.b32.xlu0 %v3345_v59, %s4695_s3  ;;  %v4414_v61 = vpop.f32.mrb[31].mxu1  ;;  %v4049_v59 = vld [vmem:[%s5425_s10 + $0x60] sm:$0xff]  ;;  %v4050_v60 = vld [vmem:[%s5425_s10 + $0x68] sm:$0xff] }
 0xfe0   :  { %v4544_v61 = vpack.c.bf16 %v4050_v60, %v4049_v59 }
 0xfe1   :  { %v3421_v62 = vpop.f32.mrb[42].mxu0 }
 0xfe2   :  { %3445 = vrot.lane.b32.xlu1 %v3421_v62, %s4695_s3  ;;  %v4419_v29 = vpop.f32.mrb[43].mxu0  ;;  %v4051_v62 = vld [vmem:[%s5425_s10 + $0x70] sm:$0xff] }
 0xfe3   :  { %v4052_v29 = vld [vmem:[%s5425_s10 + $0x78] sm:$0xff] }
0x1048   :  { %v3428_v30 = vpop.permute.xlu0 %3427 }
0x1049   :  { %v3449_v1 = vsel %vm83_vm0, %v2889_v43, %v3428_v30  ;;  %v4035_v43 = vld [vmem:[%s5427_s12 + $0x1] ss:$0 sm:$0xff]  ;;  %v4548_v30 = vpack.c.bf16 %v4052_v29, %v4051_v62 }
0x104c   :  { %v3430_v63 = vpop.permute.xlu1 %3429 }
0x104d   :  { %v3436_v0 = vpop.permute.xlu0 %3435  ;;  %v3450_v6 = vsel %vm83_vm0, %v2965_v41, %v3430_v63  ;;  %v4042_v63 = vld [vmem:[%s5424_s9 + $0x1] ss:$0 sm:$0xff] }
0x104e   :  { %v3451_v3 = vsel %vm1615_vm3, %v3449_v1, %v3436_v0 }
0x1050   :  { %v3438_v2 = vpop.permute.xlu1 %3437 }
0x1051   :  { %v3444_v4 = vpop.permute.xlu0 %3443  ;;  %v3452_v7 = vsel %vm1615_vm3, %v3450_v6, %v3438_v2 }
0x1052   :  { %v3453_v5 = vsel %vm1618_vm4, %v3451_v3, %v3444_v4 }
0x1053   :  { %4428 = vmatprep.mubr.msk.f32.mxu1 %vm181_vm1, %v3453_v5 }
0x1054   :  { %v3446_v8 = vpop.permute.xlu1 %3445 }
0x1055   :  { %v3454_v18 = vsel %vm1618_vm4, %v3452_v7, %v3446_v8 }
0x1056   :  { %4429 = vmatmul.mubr.msk.f32.vlgmr.msra.gmra.mrb[32].mxu1 %vm181_vm1, %v3454_v18 }
0x1057   :  { %4539 = vmatpush3.bf16.msra.mxu1 %v4536_v55 }
0x1058   :  { %4541 = vmatprep.subr.bf16.mxu1 %v4540_v58 }
0x105b   :  { %4543 = vmatpush3.bf16.msra.mxu1 %v4540_v58 }
0x105c   :  { %4545 = vmatprep.subr.bf16.mxu1 %v4544_v61 }
0x105f   :  { %4547 = vmatpush3.bf16.msra.mxu1 %v4544_v61  ;;  %v4060_v61 = vld [vmem:[%s5432_s17] ss:$0 sm:$0xff] }
0x1060   :  { %4549 = vmatprep.subr.bf16.mxu1 %v4548_v30 }
0x1063   :  { %4551 = vmatpush3.bf16.msra.mxu1 %v4548_v30 }
0x1129   :  { %v4430_v9 = vpop.f32.mrb[32].mxu1 }
0x112a   :  { %v3546_v10 = vadd.f32 %v4430_v9, %v4030_v17  ;;  %v3540_v11 = vpop.f32.mrb[33].mxu1 }
0x112b   :  { %v3541_v12 = vadd.f32 %v4030_v17, %v3540_v11 }
0x112c   :  { %v3550_v13 = vadd.f32 %v3546_v10, %v5125_v39 }
0x112d   :  { %v3549_v14 = vadd.f32 %v3541_v12, %v5123_v38  ;;  %v4037_v38 = vld [vmem:[%s5423_s8 + $0x20] sm:$0xff] }
0x112e   :  { %v3558_v47 = vsel %vm181_vm1, %v3550_v13, 0.0  ;;  %v4528_v28 = vpack.c.bf16 %v4038_v27, %v4037_v38  ;;  %v4054_v12 = vld [vmem:[%s5426_s11 + $0x1] ss:$0 sm:$0xff] }
0x112f   :  { %3559 = vadd.xlane.f32.xlu1 %v3558_v47  ;;  %v3555_v51 = vsel %vm181_vm1, %v3549_v14, 0.0 }
0x1130   :  { %3556 = vadd.xlane.f32.xlu0 %v3555_v51  ;;  %4529 = vmatprep.subr.bf16.mxu0 %v4528_v28 }
0x1131   :  { %4531 = vmatpush3.bf16.msra.mxu0 %v4528_v28 }
0x1132   :  { %4533 = vmatprep.subr.bf16.mxu0 %v4532_v33 }
0x1135   :  { %4535 = vmatpush3.bf16.msra.mxu0 %v4532_v33  ;;  %v3852_v33 = vld [vmem:[%s5431_s16 + $0x8] sm:$0xff] }
0x11bc   :  { %v3560_v15 = vpop.xlane.xlu1 %3559 }
0x11bd   :  { %v3562_v16 = vmul.f32 0.03125, %v3560_v15  ;;  %v3557_v19 = vpop.xlane.xlu0 %3556 }
0x11be   :  { %v3561_v20 = vmul.f32 0.03125, %v3557_v19 }
0x11bf   :  { %v3564_v22 = vsub.f32 %v3550_v13, %v3562_v16 }
0x11c0   :  { %v3563_v23 = vsub.f32 %v3549_v14, %v3561_v20 }
0x11c1   :  { %v3566_v26 = vmul.f32 %v3564_v22, %v3564_v22 }
0x11c2   :  { %v3565_v24 = vmul.f32 %v3563_v23, %v3563_v23 }
0x11c3   :  { %v3570_v39 = vsel %vm181_vm1, %v3566_v26, 0.0 }
0x11c4   :  { %v3567_v25 = vsel %vm181_vm1, %v3565_v24, 0.0 }
0x11c5   :  { %3568 = vadd.xlane.f32.xlu0 %v3567_v25 }
0x11c9   :  { %3571 = vadd.xlane.f32.xlu0 %v3570_v39 }
0x1252   :  { %v3569_v34 = vpop.xlane.xlu0 %3568 }
0x1253   :  { %v3573_v35 = vmul.f32 0.03125, %v3569_v34  ;;  %v3853_v34 = vld [vmem:[%s5431_s16 + $0x10] sm:$0xff] }
0x1255   :  { %v3575_v36 = vadd.f32 1e-05, %v3573_v35  ;;  %v4552_v35 = vpack.c.bf16 %v3852_v33, %v3851_v32 }
0x1256   :  { %v3572_v37 = vpop.xlane.xlu0 %3571 }
0x1257   :  { %4648 = vrsqrt.f32 %v3575_v36  ;;  %v3574_v40 = vmul.f32 0.03125, %v3572_v37  ;;  %v3854_v36 = vld [vmem:[%s5431_s16 + $0x18] sm:$0xff]  ;;  %4553 = vmatprep.subr.bf16.mxu0 %v4552_v35 }
0x1258   :  { %v4556_v37 = vpack.c.bf16 %v3854_v36, %v3853_v34 }
0x1259   :  { %v3576_v41 = vadd.f32 1e-05, %v3574_v40 }
0x125b   :  { %4650 = vrsqrt.f32 %v3576_v41 }
0x1261   :  { %v4649_v42 = vpop.eup %4648 }
0x1262   :  { %v3579_v44 = vmul.f32 %v4649_v42, %v3563_v23 }
0x1264   :  { %v3587_v46 = vmul.f32 %v4035_v43, %v3579_v44 }
0x1265   :  { %v4651_v48 = vpop.eup %4650 }
0x1266   :  { %v3580_v21 = vmul.f32 %v4651_v48, %v3564_v22  ;;  %v3595_v49 = vadd.f32 %v4036_v45, %v3587_v46  ;;  %v4058_v48 = vld [vmem:[%s5429_s14 + $0x1] ss:$0 sm:$0xff] }
0x1268   :  { %v3588_v50 = vmul.f32 %v4035_v43, %v3580_v21  ;;  %4439 = vmatprep.mubr.msk.f32.mxu0 %vm181_vm1, %v3595_v49 }
0x126a   :  { %v3596_v52 = vadd.f32 %v4036_v45, %v3588_v50 }
0x126c   :  { %4440 = vmatmul.mubr.msk.f32.vlgmr.msra.gmra.mrb[44].mxu0 %vm181_vm1, %v3596_v52 }
0x126d   :  { %4555 = vmatpush3.bf16.msra.mxu0 %v4552_v35 }
0x126e   :  { %4557 = vmatprep.subr.bf16.mxu0 %v4556_v37 }
0x1271   :  { %4559 = vmatpush3.bf16.msra.mxu0 %v4556_v37 }
0x133f   :  { %v4441_v0 = vpop.f32.mrb[44].mxu0 }
0x1340   :  { %v3688_v1 = vadd.f32 %v4441_v0, %v4042_v63  ;;  %v3682_v2 = vpop.f32.mrb[45].mxu0 }
0x1341   :  { %v3683_v3 = vadd.f32 %v4042_v63, %v3682_v2 }
0x1342   :  { %v3694_v4 = vmul.f32 0.70710677, %v3688_v1  ;;  %v3692_v9 = vmul.f32 0.5, %v3688_v1 }
0x1343   :  { %v3693_v5 = vmul.f32 0.70710677, %v3683_v3  ;;  %v3691_v18 = vmul.f32 0.5, %v3683_v3 }
0x1344   :  { %4652 = verf.f32 %v3694_v4 }
0x1345   :  { %4654 = verf.f32 %v3693_v5 }
0x134e   :  { %v4653_v6 = vpop.eup %4652 }
0x134f   :  { %v4655_v7 = vpop.eup %4654  ;;  %v3698_v8 = vadd.f32 1.0, %v4653_v6 }
0x1350   :  { %v3697_v17 = vadd.f32 1.0, %v4655_v7 }
0x1351   :  { %v3700_v11 = vmul.f32 %v3698_v8, %v3692_v9 }
0x1352   :  { %v3699_v10 = vmul.f32 %v3697_v17, %v3691_v18 }
0x1354   :  { %4458 = vmatprep.mubr.msk.f32.mxu1 %vm1877_vm5, %v3699_v10 }
0x1355   :  { %4459 = vmatmul.mubr.msk.f32.vlgmr.msra.gmra.mrb[34].mxu1 %vm1877_vm5, %v3700_v11 }
0x1428   :  { %v4460_v13 = vpop.f32.mrb[34].mxu1 }
0x1429   :  { %v3796_v14 = vadd.f32 %v4460_v13, %v4054_v12  ;;  %v3790_v47 = vpop.f32.mrb[35].mxu1 }
0x142a   :  { %v3791_v51 = vadd.f32 %v4054_v12, %v3790_v47 }
0x142b   :  { %v3800_v15 = vadd.f32 %v3796_v14, %v3596_v52  ;;  %v4059_v52 = vld [vmem:[#allocation2 + $0x1] ss:$0 sm:$0xff] }
0x142c   :  { %v3799_v16 = vadd.f32 %v3791_v51, %v3595_v49 }
0x142d   :  { %v3808_v19 = vsel %vm181_vm1, %v3800_v15, 0.0 }
0x142e   :  { %3809 = vadd.xlane.f32.xlu0 %v3808_v19  ;;  %v3805_v20 = vsel %vm181_vm1, %v3799_v16, 0.0 }
0x142f   :  { %3806 = vadd.xlane.f32.xlu1 %v3805_v20 }
0x14bb   :  { %v3810_v22 = vpop.xlane.xlu0 %3809 }
0x14bc   :  { %v3812_v23 = vmul.f32 0.03125, %v3810_v22  ;;  %v3807_v24 = vpop.xlane.xlu1 %3806 }
0x14bd   :  { %v3811_v25 = vmul.f32 0.03125, %v3807_v24 }
0x14be   :  { %v3814_v26 = vsub.f32 %v3800_v15, %v3812_v23 }
0x14bf   :  { %v3813_v39 = vsub.f32 %v3799_v16, %v3811_v25 }
0x14c0   :  { %v3816_v38 = vmul.f32 %v3814_v26, %v3814_v26 }
0x14c1   :  { %v3815_v27 = vmul.f32 %v3813_v39, %v3813_v39 }
0x14c2   :  { %v3820_v28 = vsel %vm181_vm1, %v3816_v38, 0.0 }
0x14c3   :  { %3821 = vadd.xlane.f32.xlu0 %v3820_v28  ;;  %v3817_v31 = vsel %vm181_vm1, %v3815_v27, 0.0 }
0x14c4   :  { %3818 = vadd.xlane.f32.xlu1 %v3817_v31 }
0x1550   :  { %v3822_v40 = vpop.xlane.xlu0 %3821 }
0x1551   :  { %v3824_v41 = vmul.f32 0.03125, %v3822_v40  ;;  %v3819_v42 = vpop.xlane.xlu1 %3818 }
0x1552   :  { %v3823_v43 = vmul.f32 0.03125, %v3819_v42 }
0x1553   :  { %v3826_v44 = vadd.f32 1e-05, %v3824_v41 }
0x1554   :  { %v3825_v45 = vadd.f32 1e-05, %v3823_v43 }
0x1555   :  { %4656 = vrsqrt.f32 %v3826_v44 }
0x1556   :  { %4658 = vrsqrt.f32 %v3825_v45 }
0x155f   :  { %v4657_v46 = vpop.eup %4656 }
0x1560   :  { %v4659_v21 = vpop.eup %4658  ;;  %v3830_v49 = vmul.f32 %v4657_v46, %v3814_v26 }
0x1561   :  { %v3829_v50 = vmul.f32 %v4659_v21, %v3813_v39 }
0x1562   :  { %v3838_v53 = vmul.f32 %v4058_v48, %v3830_v49 }
0x1563   :  { %v3837_v54 = vmul.f32 %v4058_v48, %v3829_v50 }
0x1564   :  { %v3846_v55 = vadd.f32 %v4059_v52, %v3838_v53 }
0x1565   :  { %v3845_v56 = vadd.f32 %v4059_v52, %v3837_v54 }
0x1566   :  { %v3848_v57 = vmul.f32 0.01, %v3846_v55 }
0x1567   :  { %v3847_v58 = vmul.f32 0.01, %v3845_v56 }
0x1568   :  { %v3850_v60 = vmax.f32 %v3846_v55, %v3848_v57 }
0x1569   :  { %v3849_v59 = vmax.f32 %v3845_v56, %v3847_v58 }
0x156b   :  { %4469 = vmatprep.mubr.msk.f32.mxu0 %vm181_vm1, %v3849_v59 }
0x156c   :  { %4470 = vmatmul.mubr.msk.f32.vlgmr.msra.gmra.mrb[46].mxu0 %vm181_vm1, %v3850_v60 }
0x163f   :  { %v4471_v62 = vpop.f32.mrb[46].mxu0 }
0x1640   :  { %v3940_v29 = vadd.f32 %v4471_v62, %v4060_v61  ;;  %v3934_v30 = vpop.f32.mrb[47].mxu0 }
0x1641   :  { %v3935_v63 = vadd.f32 %v4060_v61, %v3934_v30 }
0x1642   :  { %3944 = vst [vmem:[%s5433_s18 + $0x8] sm:$0xff] %v3940_v29 }
0x1643   :  { %3943 = vst [vmem:[%s5433_s18] sm:$0xff] %v3935_v63 }
0x1644   :  { %3949 = vsyncpa [#allocation3], 1 }

</bundles_post_ra>
